<compile_context>
chip_gen: v6e
topology: v6e:2x2x1
jax: 0.10.0
libtpu: 0.0.40
codegen_flags: <defaults>
</compile_context>

<pallas_src>
import math
import functools

import jax
import jax.numpy as jnp
from jax.experimental import pallas as pl
from jax.experimental.pallas import tpu as pltpu


def _layernorm(x, gamma, beta, eps=1e-5):
    # x: (T, E); gamma/beta: (1, E). Mean / biased var over last dim (PyTorch LayerNorm).
    mean = jnp.mean(x, axis=-1, keepdims=True)
    var = jnp.mean((x - mean) ** 2, axis=-1, keepdims=True)
    return (x - mean) * jax.lax.rsqrt(var + eps) * gamma + beta


def transformer_block_kernel(
    x_ref, mask_ref,
    wqkv_ref, wo_ref, vec_ref, w1_ref, b1_ref, w2_ref,
    out_ref,
    ctx_ref,
    *, heads, head_dim, embed_size, seq_len, b_blk,
):
    E, D, S, B = embed_size, head_dim, seq_len, b_blk
    f32, bf16 = jnp.float32, jnp.bfloat16

    # Stacked token slab for this grid step: T = B * S rows.
    x = x_ref[...].astype(f32)                                          # (T, E)

    # ---- fused QKV projection, feature-major, ONE MXU matmul ----
    # (3E, E) contracted with (T, E) over the E dims -> (3E, T); no separate x^T DMA.
    # rows [0:E) = q^T (1/sqrt(E) already folded into the weights), [E:2E) = k^T, [2E:3E) = v^T.
    # Cast to bf16 ONCE: it is only ever consumed by bf16 MXU matmuls below.
    qkv_t = jax.lax.dot_general(
        wqkv_ref[...], x.astype(bf16), (((1,), (1,)), ((), ())),
        preferred_element_type=f32).astype(bf16)                        # (3E, T) bf16

    neg = f32(-1e20 / math.sqrt(float(E)))   # masked_fill(-1e20) then /sqrt(E), as in PyTorch
    mask = mask_ref[...].astype(f32)                                    # (B, S)

    # ---- per-batch, per-head attention; contexts land in a (T, E) VMEM scratch ----
    for b in range(B):
        # Additive key-padding bias, materialised ONCE per batch element (hoisted out of
        # the head loop; one broadcast + one add per head instead of broadcast + select).
        bias = jnp.broadcast_to(
            jnp.where(mask[b:b + 1, :] == 0.0, neg, f32(0.0)), (S, S))  # (S, S)
        c0 = b * S
        for h in range(heads):
            qT = qkv_t[h * D:(h + 1) * D, c0:c0 + S]                    # (D, S)
            kT = qkv_t[E + h * D:E + (h + 1) * D, c0:c0 + S]            # (D, S)
            vT = qkv_t[2 * E + h * D:2 * E + (h + 1) * D, c0:c0 + S]    # (D, S)

            # scores[q, k] = sum_d qT[d, q] * kT[d, k]   (already scaled)
            s = jax.lax.dot_general(qT, kT, (((0,), (0,)), ((), ())),
                                    preferred_element_type=f32)         # (S, S)
            s = s + bias

            # numerically-stable softmax over keys; reciprocal on the EUP
            m = jnp.max(s, axis=-1, keepdims=True)
            e = jnp.exp(s - m)
            p = e * pl.reciprocal(jnp.sum(e, axis=-1, keepdims=True), approx=True)

            # ctx[q, d] = sum_k p[q, k] * vT[d, k]
            ctx = jax.lax.dot_general(p.astype(bf16), vT, (((1,), (1,)), ((), ())),
                                      preferred_element_type=f32)       # (S, D)
            ctx_ref[c0:c0 + S, h * D:(h + 1) * D] = ctx

    vec = vec_ref[...]                    # (8, E): bo, g1, beta1, b2, g2, beta2, 0, 0

    # ---- fc_out as ONE K=E matmul (full MXU fill), instead of heads K=D matmuls ----
    attn_out = jnp.dot(ctx_ref[...].astype(bf16), wo_ref[...],
                       preferred_element_type=f32) + vec[0:1, :]        # (T, E)

    # ---- residual + LayerNorm 1 (dropout = identity in eval) ----
    x1 = _layernorm(attn_out + x, vec[1:2, :], vec[2:3, :])

    # ---- feed-forward: Linear -> ReLU -> Linear (bf16 MXU, f32 accumulation) ----
    h1 = jnp.dot(x1.astype(bf16), w1_ref[...], preferred_element_type=f32) + b1_ref[...]
    h1 = jnp.maximum(h1, 0.0)
    ff = jnp.dot(h1.astype(bf16), w2_ref[...], preferred_element_type=f32) + vec[3:4, :]

    # ---- residual + LayerNorm 2 (dropout = identity in eval) ----
    out = _layernorm(ff + x1, vec[4:5, :], vec[5:6, :])
    out_ref[...] = out.astype(out_ref.dtype)


@functools.lru_cache(maxsize=None)
def _vmem_limit_bytes():
    # Chip-aware VMEM limit: leave ~16 MiB headroom for compiler scratch / output buffers.
    # v7x (64 MiB physical) -> ~48 MiB; v5e/v6e (128 MiB) -> ~112 MiB.
    try:
        cap = int(pltpu.get_tpu_info().vmem_capacity_bytes)
    except Exception:
        cap = 64 * 1024 * 1024
    return max(32 * 1024 * 1024, min(cap - 16 * 1024 * 1024, 112 * 1024 * 1024))


def _build_call(N, S, E, heads, head_dim, ff_dim, b_blk, out_dtype, *, single_buffer_weights):
    T = b_blk * S
    kernel = functools.partial(
        transformer_block_kernel, heads=heads, head_dim=head_dim,
        embed_size=E, seq_len=S, b_blk=b_blk)

    def const_spec(shape):
        index_map = lambda n: (0,) * len(shape)
        if single_buffer_weights:
            # Grid-invariant blocks: single-buffer them to halve resident weight VMEM.
            return pl.BlockSpec(shape, index_map, pipeline_mode=pl.Buffered(1))
        return pl.BlockSpec(shape, index_map)

    return pl.pallas_call(
        kernel,
        out_shape=jax.ShapeDtypeStruct((N * S, E), out_dtype),
        grid_spec=pltpu.PrefetchScalarGridSpec(
            num_scalar_prefetch=0,
            grid=(N // b_blk,),
            in_specs=[
                pl.BlockSpec((T, E), lambda n: (n, 0)),      # x, token-major (single DMA)
                pl.BlockSpec((b_blk, S), lambda n: (n, 0)),  # key-padding mask
                const_spec((3 * E, E)),                      # fused QKV slab (bf16)
                const_spec((E, E)),                          # fc_out weight (bf16)
                const_spec((8, E)),                          # packed bias/LN vectors (f32)
                const_spec((E, ff_dim)),                     # w1 (bf16)
                const_spec((1, ff_dim)),                     # b1 (f32)
                const_spec((ff_dim, E)),                     # w2 (bf16)
            ],
            out_specs=pl.BlockSpec((T, E), lambda n: (n, 0)),
            scratch_shapes=[pltpu.VMEM((T, E), jnp.float32)],  # per-head contexts -> Wo
        ),
        compiler_params=pltpu.CompilerParams(
            dimension_semantics=("parallel",),
            vmem_limit_bytes=_vmem_limit_bytes()),
    )


# Cache of working compiled callables per shape signature (Buffered(1) probe runs once).
_WORKING_CALL = {}


def transformer_block(x, mask, params, *, heads):
    N, S, E = x.shape
    head_dim = E // heads
    ff_dim = params["w1"].shape[1]
    scale = 1.0 / math.sqrt(float(E))

    # Batch-stack small problems (fills lanes, amortises per-step overhead); keep one
    # batch element per grid step for realistic sizes.
    b_blk = N if N * S <= 256 else 1     # both branches satisfy N % b_blk == 0

    # Wrapper-side layout plumbing (pure XLA): fused feature-major QKV slab with the
    # attention scale folded into Q, packed (8, E) vector slab, bf16 weights for the MXU.
    wqkv_t = jnp.concatenate(
        [params["wq"].T * scale, params["wk"].T, params["wv"].T], axis=0
    ).astype(jnp.bfloat16)                                             # (3E, E)
    wo = params["wo"].astype(jnp.bfloat16)                             # (E, E), (in, out)
    vec = jnp.concatenate(
        [params["bo"], params["gamma1"], params["beta1"],
         params["b2"], params["gamma2"], params["beta2"],
         jnp.zeros((2, E), jnp.float32)], axis=0)                      # (8, E)
    w1 = params["w1"].astype(jnp.bfloat16)
    b1 = params["b1"].astype(jnp.float32)
    w2 = params["w2"].astype(jnp.bfloat16)

    x2d = x.reshape(N * S, E)                                          # lane-dense token slab
    args = (x2d, mask, wqkv_t, wo, vec, w1, b1, w2)

    sig = (N, S, E, heads, ff_dim, b_blk, str(x.dtype))
    call = _WORKING_CALL.get(sig)
    if call is None:
        # One-time capability probe per shape signature: prefer single-buffered
        # grid-invariant weights; fall back to default double-buffering if this Pallas
        # build rejects pl.Buffered(1).  Result is cached so subsequent calls pay no
        # host sync and no retry logic.
        try:
            call = _build_call(N, S, E, heads, head_dim, ff_dim, b_blk, x.dtype,
                               single_buffer_weights=True)
            out = jax.block_until_ready(call(*args))
            _WORKING_CALL[sig] = call
            return out.reshape(N, S, E)
        except Exception:   # probe only; genuine kernel errors resurface from the fallback
            call = _build_call(N, S, E, heads, head_dim, ff_dim, b_blk, x.dtype,
                               single_buffer_weights=False)
            _WORKING_CALL[sig] = call
    return call(*args).reshape(N, S, E)


def init_params(key, embed_size, heads, forward_expansion):
    E = embed_size
    FF = forward_expansion * E
    ks = jax.random.split(key, 8)
    scale = 1.0 / math.sqrt(E)
    # Weights stored pre-transposed (in, out) so the math matches x @ W_torch.T.
    return {
        "wq": jax.random.normal(ks[0], (E, E), jnp.float32) * scale,
        "wk": jax.random.normal(ks[1], (E, E), jnp.float32) * scale,
        "wv": jax.random.normal(ks[2], (E, E), jnp.float32) * scale,
        "wo": jax.random.normal(ks[3], (E, E), jnp.float32) * scale,
        "bo": jax.random.normal(ks[4], (1, E), jnp.float32) * 0.01,
        "gamma1": jnp.ones((1, E), jnp.float32),
        "beta1": jnp.zeros((1, E), jnp.float32),
        "w1": jax.random.normal(ks[5], (E, FF), jnp.float32) * scale,
        "b1": jax.random.normal(ks[6], (1, FF), jnp.float32) * 0.01,
        "w2": jax.random.normal(ks[7], (FF, E), jnp.float32) * (1.0 / math.sqrt(FF)),
        "b2": jnp.zeros((1, E), jnp.float32),
        "gamma2": jnp.ones((1, E), jnp.float32),
        "beta2": jnp.zeros((1, E), jnp.float32),
    }


if __name__ == "__main__":
    # Small shapes consistent with the module: N=2, S=8, embed=32, heads=4, expansion=4
    N, S, E, H, EXP = 2, 8, 32, 4, 4

    key = jax.random.PRNGKey(0)
    kx, km, kp = jax.random.split(key, 3)

    x = jax.random.normal(kx, (N, S, E), jnp.float32)
    # mask: (N, S), 1 = attend, 0 = masked out (last two key positions of batch 1 masked)
    mask = jnp.ones((N, S), jnp.float32).at[1, -2:].set(0.0)

    params = init_params(kp, E, H, EXP)

    out = transformer_block(x, mask, params, heads=H)
    out = jax.block_until_ready(out)

    assert out.shape == (N, S, E)
    assert jnp.all(jnp.isfinite(out))
    print("KERNEL_OK")
</pallas_src>

<mosaic_0001>
module attributes {stable_mosaic.version = 11 : i64} {
  func.func @transformer_block_kernel(%arg0: i32, %arg1: memref<16x32xf32, #tpu.memory_space<vmem>>, %arg2: memref<2x8xf32, #tpu.memory_space<vmem>>, %arg3: memref<96x32xbf16, #tpu.memory_space<vmem>>, %arg4: memref<32x32xbf16, #tpu.memory_space<vmem>>, %arg5: memref<8x32xf32, #tpu.memory_space<vmem>>, %arg6: memref<32x128xbf16, #tpu.memory_space<vmem>>, %arg7: memref<1x128xf32, #tpu.memory_space<vmem>>, %arg8: memref<128x32xbf16, #tpu.memory_space<vmem>>, %arg9: memref<16x32xf32, #tpu.memory_space<vmem>>, %arg10: memref<16x32xf32, #tpu.memory_space<vmem>>) attributes {dimension_semantics = [#tpu.dimension_semantics<parallel>], iteration_bounds = array<i64: 1>, scalar_prefetch = 0 : i64, scratch_operands = 1 : i64, tpu.core_type = #tpu.core_type<tc>, window_params = [{transform_indices = @transform_0, window_bounds = array<i64: 16, 32>}, {transform_indices = @transform_1, window_bounds = array<i64: 2, 8>}, {pipeline_mode = #tpu.pipeline_mode<synchronous>, transform_indices = @transform_2, window_bounds = array<i64: 96, 32>}, {pipeline_mode = #tpu.pipeline_mode<synchronous>, transform_indices = @transform_3, window_bounds = array<i64: 32, 32>}, {pipeline_mode = #tpu.pipeline_mode<synchronous>, transform_indices = @transform_4, window_bounds = array<i64: 8, 32>}, {pipeline_mode = #tpu.pipeline_mode<synchronous>, transform_indices = @transform_5, window_bounds = array<i64: 32, 128>}, {pipeline_mode = #tpu.pipeline_mode<synchronous>, transform_indices = @transform_6, window_bounds = array<i64: 1, 128>}, {pipeline_mode = #tpu.pipeline_mode<synchronous>, transform_indices = @transform_7, window_bounds = array<i64: 128, 32>}, {transform_indices = @transform_8, window_bounds = array<i64: 16, 32>}]} {
    %c0 = arith.constant 0 : index
    %c0_0 = arith.constant 0 : index
    %0 = vector.load %arg1[%c0, %c0_0] : memref<16x32xf32, #tpu.memory_space<vmem>>, vector<16x32xf32>
    %c0_1 = arith.constant 0 : index
    %c0_2 = arith.constant 0 : index
    %1 = vector.load %arg3[%c0_1, %c0_2] : memref<96x32xbf16, #tpu.memory_space<vmem>>, vector<96x32xbf16>
    %2 = arith.truncf %0 : vector<16x32xf32> to vector<16x32xbf16>
    %cst = arith.constant dense<0.000000e+00> : vector<96x16xf32>
    %3 = tpu.matmul %1, %2, %cst {dimension_numbers = #tpu.dot_dimension_numbers<[1], [1], [0], [0], [0, 0, 1, 0], [], []>} : vector<96x32xbf16>, vector<16x32xbf16>, vector<96x16xf32> -> vector<96x16xf32>
    %4 = arith.truncf %3 : vector<96x16xf32> to vector<96x16xbf16>
    %c0_3 = arith.constant 0 : index
    %c0_4 = arith.constant 0 : index
    %5 = vector.load %arg2[%c0_3, %c0_4] : memref<2x8xf32, #tpu.memory_space<vmem>>, vector<2x8xf32>
    %6 = vector.extract_strided_slice %5 {offsets = [0, 0], sizes = [1, 8], strides = [1, 1]} : vector<2x8xf32> to vector<1x8xf32>
    %cst_5 = arith.constant 0.000000e+00 : f32
    %7 = vector.broadcast %cst_5 : f32 to vector<1x8xf32>
    %8 = arith.cmpf oeq, %6, %7 : vector<1x8xf32>
    %cst_6 = arith.constant -1.76776698E+19 : f32
    %cst_7 = arith.constant 0.000000e+00 : f32
    %9 = vector.broadcast %cst_6 : f32 to vector<1x8xf32>
    %10 = vector.broadcast %cst_7 : f32 to vector<1x8xf32>
    %11 = arith.select %8, %9, %10 : vector<1x8xi1>, vector<1x8xf32>
    %12 = vector.shape_cast %11 : vector<1x8xf32> to vector<1x8xf32>
    %13 = vector.broadcast %12 : vector<1x8xf32> to vector<8x8xf32>
    %14 = vector.extract_strided_slice %4 {offsets = [0, 0], sizes = [8, 8], strides = [1, 1]} : vector<96x16xbf16> to vector<8x8xbf16>
    %15 = vector.extract_strided_slice %4 {offsets = [32, 0], sizes = [8, 8], strides = [1, 1]} : vector<96x16xbf16> to vector<8x8xbf16>
    %16 = vector.extract_strided_slice %4 {offsets = [64, 0], sizes = [8, 8], strides = [1, 1]} : vector<96x16xbf16> to vector<8x8xbf16>
    %cst_8 = arith.constant dense<0.000000e+00> : vector<8x8xf32>
    %17 = tpu.matmul %14, %15, %cst_8 {dimension_numbers = #tpu.dot_dimension_numbers<[0], [0], [1], [1], [0, 1, 1, 1], [], []>} : vector<8x8xbf16>, vector<8x8xbf16>, vector<8x8xf32> -> vector<8x8xf32>
    %18 = arith.addf %17, %13 : vector<8x8xf32>
    %cst_9 = arith.constant dense<0xFF800000> : vector<8xf32>
    %19 = vector.multi_reduction <maximumf>, %18, %cst_9 [1] : vector<8x8xf32> to vector<8xf32>
    %20 = vector.shape_cast %19 : vector<8xf32> to vector<8x1xf32>
    %21 = vector.broadcast %20 : vector<8x1xf32> to vector<8x8xf32>
    %22 = arith.subf %18, %21 : vector<8x8xf32>
    %23 = math.exp %22 : vector<8x8xf32>
    %cst_10 = arith.constant dense<0.000000e+00> : vector<8xf32>
    %24 = vector.multi_reduction <add>, %23, %cst_10 [1] : vector<8x8xf32> to vector<8xf32>
    %25 = vector.shape_cast %24 : vector<8xf32> to vector<8x1xf32>
    %26 = tpu.reciprocal %25 {approx = true} : vector<8x1xf32> -> vector<8x1xf32>
    %27 = vector.broadcast %26 : vector<8x1xf32> to vector<8x8xf32>
    %28 = arith.mulf %23, %27 : vector<8x8xf32>
    %29 = arith.truncf %28 : vector<8x8xf32> to vector<8x8xbf16>
    %cst_11 = arith.constant dense<0.000000e+00> : vector<8x8xf32>
    %30 = tpu.matmul %29, %16, %cst_11 {dimension_numbers = #tpu.dot_dimension_numbers<[1], [1], [0], [0], [0, 0, 1, 0], [], []>} : vector<8x8xbf16>, vector<8x8xbf16>, vector<8x8xf32> -> vector<8x8xf32>
    %c0_12 = arith.constant 0 : index
    %c0_13 = arith.constant 0 : index
    %31 = vector.load %arg10[%c0_12, %c0_13] : memref<16x32xf32, #tpu.memory_space<vmem>>, vector<8x8xf32>
    tpu.vector_store %arg10[%c0_12, %c0_13], %30 {strides = array<i32>} : memref<16x32xf32, #tpu.memory_space<vmem>>, vector<8x8xf32>,
    %32 = vector.extract_strided_slice %4 {offsets = [8, 0], sizes = [8, 8], strides = [1, 1]} : vector<96x16xbf16> to vector<8x8xbf16>
    %33 = vector.extract_strided_slice %4 {offsets = [40, 0], sizes = [8, 8], strides = [1, 1]} : vector<96x16xbf16> to vector<8x8xbf16>
    %34 = vector.extract_strided_slice %4 {offsets = [72, 0], sizes = [8, 8], strides = [1, 1]} : vector<96x16xbf16> to vector<8x8xbf16>
    %cst_14 = arith.constant dense<0.000000e+00> : vector<8x8xf32>
    %35 = tpu.matmul %32, %33, %cst_14 {dimension_numbers = #tpu.dot_dimension_numbers<[0], [0], [1], [1], [0, 1, 1, 1], [], []>} : vector<8x8xbf16>, vector<8x8xbf16>, vector<8x8xf32> -> vector<8x8xf32>
    %36 = arith.addf %35, %13 : vector<8x8xf32>
    %cst_15 = arith.constant dense<0xFF800000> : vector<8xf32>
    %37 = vector.multi_reduction <maximumf>, %36, %cst_15 [1] : vector<8x8xf32> to vector<8xf32>
    %38 = vector.shape_cast %37 : vector<8xf32> to vector<8x1xf32>
    %39 = vector.broadcast %38 : vector<8x1xf32> to vector<8x8xf32>
    %40 = arith.subf %36, %39 : vector<8x8xf32>
    %41 = math.exp %40 : vector<8x8xf32>
    %cst_16 = arith.constant dense<0.000000e+00> : vector<8xf32>
    %42 = vector.multi_reduction <add>, %41, %cst_16 [1] : vector<8x8xf32> to vector<8xf32>
    %43 = vector.shape_cast %42 : vector<8xf32> to vector<8x1xf32>
    %44 = tpu.reciprocal %43 {approx = true} : vector<8x1xf32> -> vector<8x1xf32>
    %45 = vector.broadcast %44 : vector<8x1xf32> to vector<8x8xf32>
    %46 = arith.mulf %41, %45 : vector<8x8xf32>
    %47 = arith.truncf %46 : vector<8x8xf32> to vector<8x8xbf16>
    %cst_17 = arith.constant dense<0.000000e+00> : vector<8x8xf32>
    %48 = tpu.matmul %47, %34, %cst_17 {dimension_numbers = #tpu.dot_dimension_numbers<[1], [1], [0], [0], [0, 0, 1, 0], [], []>} : vector<8x8xbf16>, vector<8x8xbf16>, vector<8x8xf32> -> vector<8x8xf32>
    %c0_18 = arith.constant 0 : index
    %c8 = arith.constant 8 : index
    %49 = vector.load %arg10[%c0_18, %c8] : memref<16x32xf32, #tpu.memory_space<vmem>>, vector<8x8xf32>
    tpu.vector_store %arg10[%c0_18, %c8], %48 {strides = array<i32>} : memref<16x32xf32, #tpu.memory_space<vmem>>, vector<8x8xf32>,
    %50 = vector.extract_strided_slice %4 {offsets = [16, 0], sizes = [8, 8], strides = [1, 1]} : vector<96x16xbf16> to vector<8x8xbf16>
    %51 = vector.extract_strided_slice %4 {offsets = [48, 0], sizes = [8, 8], strides = [1, 1]} : vector<96x16xbf16> to vector<8x8xbf16>
    %52 = vector.extract_strided_slice %4 {offsets = [80, 0], sizes = [8, 8], strides = [1, 1]} : vector<96x16xbf16> to vector<8x8xbf16>
    %cst_19 = arith.constant dense<0.000000e+00> : vector<8x8xf32>
    %53 = tpu.matmul %50, %51, %cst_19 {dimension_numbers = #tpu.dot_dimension_numbers<[0], [0], [1], [1], [0, 1, 1, 1], [], []>} : vector<8x8xbf16>, vector<8x8xbf16>, vector<8x8xf32> -> vector<8x8xf32>
    %54 = arith.addf %53, %13 : vector<8x8xf32>
    %cst_20 = arith.constant dense<0xFF800000> : vector<8xf32>
    %55 = vector.multi_reduction <maximumf>, %54, %cst_20 [1] : vector<8x8xf32> to vector<8xf32>
    %56 = vector.shape_cast %55 : vector<8xf32> to vector<8x1xf32>
    %57 = vector.broadcast %56 : vector<8x1xf32> to vector<8x8xf32>
    %58 = arith.subf %54, %57 : vector<8x8xf32>
    %59 = math.exp %58 : vector<8x8xf32>
    %cst_21 = arith.constant dense<0.000000e+00> : vector<8xf32>
    %60 = vector.multi_reduction <add>, %59, %cst_21 [1] : vector<8x8xf32> to vector<8xf32>
    %61 = vector.shape_cast %60 : vector<8xf32> to vector<8x1xf32>
    %62 = tpu.reciprocal %61 {approx = true} : vector<8x1xf32> -> vector<8x1xf32>
    %63 = vector.broadcast %62 : vector<8x1xf32> to vector<8x8xf32>
    %64 = arith.mulf %59, %63 : vector<8x8xf32>
    %65 = arith.truncf %64 : vector<8x8xf32> to vector<8x8xbf16>
    %cst_22 = arith.constant dense<0.000000e+00> : vector<8x8xf32>
    %66 = tpu.matmul %65, %52, %cst_22 {dimension_numbers = #tpu.dot_dimension_numbers<[1], [1], [0], [0], [0, 0, 1, 0], [], []>} : vector<8x8xbf16>, vector<8x8xbf16>, vector<8x8xf32> -> vector<8x8xf32>
    %c0_23 = arith.constant 0 : index
    %c16 = arith.constant 16 : index
    %67 = vector.load %arg10[%c0_23, %c16] : memref<16x32xf32, #tpu.memory_space<vmem>>, vector<8x8xf32>
    tpu.vector_store %arg10[%c0_23, %c16], %66 {strides = array<i32>} : memref<16x32xf32, #tpu.memory_space<vmem>>, vector<8x8xf32>,
    %68 = vector.extract_strided_slice %4 {offsets = [24, 0], sizes = [8, 8], strides = [1, 1]} : vector<96x16xbf16> to vector<8x8xbf16>
    %69 = vector.extract_strided_slice %4 {offsets = [56, 0], sizes = [8, 8], strides = [1, 1]} : vector<96x16xbf16> to vector<8x8xbf16>
    %70 = vector.extract_strided_slice %4 {offsets = [88, 0], sizes = [8, 8], strides = [1, 1]} : vector<96x16xbf16> to vector<8x8xbf16>
    %cst_24 = arith.constant dense<0.000000e+00> : vector<8x8xf32>
    %71 = tpu.matmul %68, %69, %cst_24 {dimension_numbers = #tpu.dot_dimension_numbers<[0], [0], [1], [1], [0, 1, 1, 1], [], []>} : vector<8x8xbf16>, vector<8x8xbf16>, vector<8x8xf32> -> vector<8x8xf32>
    %72 = arith.addf %71, %13 : vector<8x8xf32>
    %cst_25 = arith.constant dense<0xFF800000> : vector<8xf32>
    %73 = vector.multi_reduction <maximumf>, %72, %cst_25 [1] : vector<8x8xf32> to vector<8xf32>
    %74 = vector.shape_cast %73 : vector<8xf32> to vector<8x1xf32>
    %75 = vector.broadcast %74 : vector<8x1xf32> to vector<8x8xf32>
    %76 = arith.subf %72, %75 : vector<8x8xf32>
    %77 = math.exp %76 : vector<8x8xf32>
    %cst_26 = arith.constant dense<0.000000e+00> : vector<8xf32>
    %78 = vector.multi_reduction <add>, %77, %cst_26 [1] : vector<8x8xf32> to vector<8xf32>
    %79 = vector.shape_cast %78 : vector<8xf32> to vector<8x1xf32>
    %80 = tpu.reciprocal %79 {approx = true} : vector<8x1xf32> -> vector<8x1xf32>
    %81 = vector.broadcast %80 : vector<8x1xf32> to vector<8x8xf32>
    %82 = arith.mulf %77, %81 : vector<8x8xf32>
    %83 = arith.truncf %82 : vector<8x8xf32> to vector<8x8xbf16>
    %cst_27 = arith.constant dense<0.000000e+00> : vector<8x8xf32>
    %84 = tpu.matmul %83, %70, %cst_27 {dimension_numbers = #tpu.dot_dimension_numbers<[1], [1], [0], [0], [0, 0, 1, 0], [], []>} : vector<8x8xbf16>, vector<8x8xbf16>, vector<8x8xf32> -> vector<8x8xf32>
    %c0_28 = arith.constant 0 : index
    %c24 = arith.constant 24 : index
    %85 = vector.load %arg10[%c0_28, %c24] : memref<16x32xf32, #tpu.memory_space<vmem>>, vector<8x8xf32>
    tpu.vector_store %arg10[%c0_28, %c24], %84 {strides = array<i32>} : memref<16x32xf32, #tpu.memory_space<vmem>>, vector<8x8xf32>,
    %86 = vector.extract_strided_slice %5 {offsets = [1, 0], sizes = [1, 8], strides = [1, 1]} : vector<2x8xf32> to vector<1x8xf32>
    %cst_29 = arith.constant 0.000000e+00 : f32
    %87 = vector.broadcast %cst_29 : f32 to vector<1x8xf32>
    %88 = arith.cmpf oeq, %86, %87 : vector<1x8xf32>
    %cst_30 = arith.constant -1.76776698E+19 : f32
    %cst_31 = arith.constant 0.000000e+00 : f32
    %89 = vector.broadcast %cst_30 : f32 to vector<1x8xf32>
    %90 = vector.broadcast %cst_31 : f32 to vector<1x8xf32>
    %91 = arith.select %88, %89, %90 : vector<1x8xi1>, vector<1x8xf32>
    %92 = vector.shape_cast %91 : vector<1x8xf32> to vector<1x8xf32>
    %93 = vector.broadcast %92 : vector<1x8xf32> to vector<8x8xf32>
    %94 = vector.extract_strided_slice %4 {offsets = [0, 8], sizes = [8, 8], strides = [1, 1]} : vector<96x16xbf16> to vector<8x8xbf16>
    %95 = vector.extract_strided_slice %4 {offsets = [32, 8], sizes = [8, 8], strides = [1, 1]} : vector<96x16xbf16> to vector<8x8xbf16>
    %96 = vector.extract_strided_slice %4 {offsets = [64, 8], sizes = [8, 8], strides = [1, 1]} : vector<96x16xbf16> to vector<8x8xbf16>
    %cst_32 = arith.constant dense<0.000000e+00> : vector<8x8xf32>
    %97 = tpu.matmul %94, %95, %cst_32 {dimension_numbers = #tpu.dot_dimension_numbers<[0], [0], [1], [1], [0, 1, 1, 1], [], []>} : vector<8x8xbf16>, vector<8x8xbf16>, vector<8x8xf32> -> vector<8x8xf32>
    %98 = arith.addf %97, %93 : vector<8x8xf32>
    %cst_33 = arith.constant dense<0xFF800000> : vector<8xf32>
    %99 = vector.multi_reduction <maximumf>, %98, %cst_33 [1] : vector<8x8xf32> to vector<8xf32>
    %100 = vector.shape_cast %99 : vector<8xf32> to vector<8x1xf32>
    %101 = vector.broadcast %100 : vector<8x1xf32> to vector<8x8xf32>
    %102 = arith.subf %98, %101 : vector<8x8xf32>
    %103 = math.exp %102 : vector<8x8xf32>
    %cst_34 = arith.constant dense<0.000000e+00> : vector<8xf32>
    %104 = vector.multi_reduction <add>, %103, %cst_34 [1] : vector<8x8xf32> to vector<8xf32>
    %105 = vector.shape_cast %104 : vector<8xf32> to vector<8x1xf32>
    %106 = tpu.reciprocal %105 {approx = true} : vector<8x1xf32> -> vector<8x1xf32>
    %107 = vector.broadcast %106 : vector<8x1xf32> to vector<8x8xf32>
    %108 = arith.mulf %103, %107 : vector<8x8xf32>
    %109 = arith.truncf %108 : vector<8x8xf32> to vector<8x8xbf16>
    %cst_35 = arith.constant dense<0.000000e+00> : vector<8x8xf32>
    %110 = tpu.matmul %109, %96, %cst_35 {dimension_numbers = #tpu.dot_dimension_numbers<[1], [1], [0], [0], [0, 0, 1, 0], [], []>} : vector<8x8xbf16>, vector<8x8xbf16>, vector<8x8xf32> -> vector<8x8xf32>
    %c8_36 = arith.constant 8 : index
    %c0_37 = arith.constant 0 : index
    %111 = vector.load %arg10[%c8_36, %c0_37] : memref<16x32xf32, #tpu.memory_space<vmem>>, vector<8x8xf32>
    tpu.vector_store %arg10[%c8_36, %c0_37], %110 {strides = array<i32>} : memref<16x32xf32, #tpu.memory_space<vmem>>, vector<8x8xf32>,
    %112 = vector.extract_strided_slice %4 {offsets = [8, 8], sizes = [8, 8], strides = [1, 1]} : vector<96x16xbf16> to vector<8x8xbf16>
    %113 = vector.extract_strided_slice %4 {offsets = [40, 8], sizes = [8, 8], strides = [1, 1]} : vector<96x16xbf16> to vector<8x8xbf16>
    %114 = vector.extract_strided_slice %4 {offsets = [72, 8], sizes = [8, 8], strides = [1, 1]} : vector<96x16xbf16> to vector<8x8xbf16>
    %cst_38 = arith.constant dense<0.000000e+00> : vector<8x8xf32>
    %115 = tpu.matmul %112, %113, %cst_38 {dimension_numbers = #tpu.dot_dimension_numbers<[0], [0], [1], [1], [0, 1, 1, 1], [], []>} : vector<8x8xbf16>, vector<8x8xbf16>, vector<8x8xf32> -> vector<8x8xf32>
    %116 = arith.addf %115, %93 : vector<8x8xf32>
    %cst_39 = arith.constant dense<0xFF800000> : vector<8xf32>
    %117 = vector.multi_reduction <maximumf>, %116, %cst_39 [1] : vector<8x8xf32> to vector<8xf32>
    %118 = vector.shape_cast %117 : vector<8xf32> to vector<8x1xf32>
    %119 = vector.broadcast %118 : vector<8x1xf32> to vector<8x8xf32>
    %120 = arith.subf %116, %119 : vector<8x8xf32>
    %121 = math.exp %120 : vector<8x8xf32>
    %cst_40 = arith.constant dense<0.000000e+00> : vector<8xf32>
    %122 = vector.multi_reduction <add>, %121, %cst_40 [1] : vector<8x8xf32> to vector<8xf32>
    %123 = vector.shape_cast %122 : vector<8xf32> to vector<8x1xf32>
    %124 = tpu.reciprocal %123 {approx = true} : vector<8x1xf32> -> vector<8x1xf32>
    %125 = vector.broadcast %124 : vector<8x1xf32> to vector<8x8xf32>
    %126 = arith.mulf %121, %125 : vector<8x8xf32>
    %127 = arith.truncf %126 : vector<8x8xf32> to vector<8x8xbf16>
    %cst_41 = arith.constant dense<0.000000e+00> : vector<8x8xf32>
    %128 = tpu.matmul %127, %114, %cst_41 {dimension_numbers = #tpu.dot_dimension_numbers<[1], [1], [0], [0], [0, 0, 1, 0], [], []>} : vector<8x8xbf16>, vector<8x8xbf16>, vector<8x8xf32> -> vector<8x8xf32>
    %c8_42 = arith.constant 8 : index
    %c8_43 = arith.constant 8 : index
    %129 = vector.load %arg10[%c8_42, %c8_43] : memref<16x32xf32, #tpu.memory_space<vmem>>, vector<8x8xf32>
    tpu.vector_store %arg10[%c8_42, %c8_43], %128 {strides = array<i32>} : memref<16x32xf32, #tpu.memory_space<vmem>>, vector<8x8xf32>,
    %130 = vector.extract_strided_slice %4 {offsets = [16, 8], sizes = [8, 8], strides = [1, 1]} : vector<96x16xbf16> to vector<8x8xbf16>
    %131 = vector.extract_strided_slice %4 {offsets = [48, 8], sizes = [8, 8], strides = [1, 1]} : vector<96x16xbf16> to vector<8x8xbf16>
    %132 = vector.extract_strided_slice %4 {offsets = [80, 8], sizes = [8, 8], strides = [1, 1]} : vector<96x16xbf16> to vector<8x8xbf16>
    %cst_44 = arith.constant dense<0.000000e+00> : vector<8x8xf32>
    %133 = tpu.matmul %130, %131, %cst_44 {dimension_numbers = #tpu.dot_dimension_numbers<[0], [0], [1], [1], [0, 1, 1, 1], [], []>} : vector<8x8xbf16>, vector<8x8xbf16>, vector<8x8xf32> -> vector<8x8xf32>
    %134 = arith.addf %133, %93 : vector<8x8xf32>
    %cst_45 = arith.constant dense<0xFF800000> : vector<8xf32>
    %135 = vector.multi_reduction <maximumf>, %134, %cst_45 [1] : vector<8x8xf32> to vector<8xf32>
    %136 = vector.shape_cast %135 : vector<8xf32> to vector<8x1xf32>
    %137 = vector.broadcast %136 : vector<8x1xf32> to vector<8x8xf32>
    %138 = arith.subf %134, %137 : vector<8x8xf32>
    %139 = math.exp %138 : vector<8x8xf32>
    %cst_46 = arith.constant dense<0.000000e+00> : vector<8xf32>
    %140 = vector.multi_reduction <add>, %139, %cst_46 [1] : vector<8x8xf32> to vector<8xf32>
    %141 = vector.shape_cast %140 : vector<8xf32> to vector<8x1xf32>
    %142 = tpu.reciprocal %141 {approx = true} : vector<8x1xf32> -> vector<8x1xf32>
    %143 = vector.broadcast %142 : vector<8x1xf32> to vector<8x8xf32>
    %144 = arith.mulf %139, %143 : vector<8x8xf32>
    %145 = arith.truncf %144 : vector<8x8xf32> to vector<8x8xbf16>
    %cst_47 = arith.constant dense<0.000000e+00> : vector<8x8xf32>
    %146 = tpu.matmul %145, %132, %cst_47 {dimension_numbers = #tpu.dot_dimension_numbers<[1], [1], [0], [0], [0, 0, 1, 0], [], []>} : vector<8x8xbf16>, vector<8x8xbf16>, vector<8x8xf32> -> vector<8x8xf32>
    %c8_48 = arith.constant 8 : index
    %c16_49 = arith.constant 16 : index
    %147 = vector.load %arg10[%c8_48, %c16_49] : memref<16x32xf32, #tpu.memory_space<vmem>>, vector<8x8xf32>
    tpu.vector_store %arg10[%c8_48, %c16_49], %146 {strides = array<i32>} : memref<16x32xf32, #tpu.memory_space<vmem>>, vector<8x8xf32>,
    %148 = vector.extract_strided_slice %4 {offsets = [24, 8], sizes = [8, 8], strides = [1, 1]} : vector<96x16xbf16> to vector<8x8xbf16>
    %149 = vector.extract_strided_slice %4 {offsets = [56, 8], sizes = [8, 8], strides = [1, 1]} : vector<96x16xbf16> to vector<8x8xbf16>
    %150 = vector.extract_strided_slice %4 {offsets = [88, 8], sizes = [8, 8], strides = [1, 1]} : vector<96x16xbf16> to vector<8x8xbf16>
    %cst_50 = arith.constant dense<0.000000e+00> : vector<8x8xf32>
    %151 = tpu.matmul %148, %149, %cst_50 {dimension_numbers = #tpu.dot_dimension_numbers<[0], [0], [1], [1], [0, 1, 1, 1], [], []>} : vector<8x8xbf16>, vector<8x8xbf16>, vector<8x8xf32> -> vector<8x8xf32>
    %152 = arith.addf %151, %93 : vector<8x8xf32>
    %cst_51 = arith.constant dense<0xFF800000> : vector<8xf32>
    %153 = vector.multi_reduction <maximumf>, %152, %cst_51 [1] : vector<8x8xf32> to vector<8xf32>
    %154 = vector.shape_cast %153 : vector<8xf32> to vector<8x1xf32>
    %155 = vector.broadcast %154 : vector<8x1xf32> to vector<8x8xf32>
    %156 = arith.subf %152, %155 : vector<8x8xf32>
    %157 = math.exp %156 : vector<8x8xf32>
    %cst_52 = arith.constant dense<0.000000e+00> : vector<8xf32>
    %158 = vector.multi_reduction <add>, %157, %cst_52 [1] : vector<8x8xf32> to vector<8xf32>
    %159 = vector.shape_cast %158 : vector<8xf32> to vector<8x1xf32>
    %160 = tpu.reciprocal %159 {approx = true} : vector<8x1xf32> -> vector<8x1xf32>
    %161 = vector.broadcast %160 : vector<8x1xf32> to vector<8x8xf32>
    %162 = arith.mulf %157, %161 : vector<8x8xf32>
    %163 = arith.truncf %162 : vector<8x8xf32> to vector<8x8xbf16>
    %cst_53 = arith.constant dense<0.000000e+00> : vector<8x8xf32>
    %164 = tpu.matmul %163, %150, %cst_53 {dimension_numbers = #tpu.dot_dimension_numbers<[1], [1], [0], [0], [0, 0, 1, 0], [], []>} : vector<8x8xbf16>, vector<8x8xbf16>, vector<8x8xf32> -> vector<8x8xf32>
    %c8_54 = arith.constant 8 : index
    %c24_55 = arith.constant 24 : index
    %165 = vector.load %arg10[%c8_54, %c24_55] : memref<16x32xf32, #tpu.memory_space<vmem>>, vector<8x8xf32>
    tpu.vector_store %arg10[%c8_54, %c24_55], %164 {strides = array<i32>} : memref<16x32xf32, #tpu.memory_space<vmem>>, vector<8x8xf32>,
    %c0_56 = arith.constant 0 : index
    %c0_57 = arith.constant 0 : index
    %166 = vector.load %arg5[%c0_56, %c0_57] : memref<8x32xf32, #tpu.memory_space<vmem>>, vector<8x32xf32>
    %c0_58 = arith.constant 0 : index
    %c0_59 = arith.constant 0 : index
    %167 = vector.load %arg10[%c0_58, %c0_59] : memref<16x32xf32, #tpu.memory_space<vmem>>, vector<16x32xf32>
    %168 = arith.truncf %167 : vector<16x32xf32> to vector<16x32xbf16>
    %c0_60 = arith.constant 0 : index
    %c0_61 = arith.constant 0 : index
    %169 = vector.load %arg4[%c0_60, %c0_61] : memref<32x32xbf16, #tpu.memory_space<vmem>>, vector<32x32xbf16>
    %cst_62 = arith.constant dense<0.000000e+00> : vector<16x32xf32>
    %170 = tpu.matmul %168, %169, %cst_62 {dimension_numbers = #tpu.dot_dimension_numbers<[1], [0], [0], [1], [0, 0, 1, 1], [], []>} : vector<16x32xbf16>, vector<32x32xbf16>, vector<16x32xf32> -> vector<16x32xf32>
    %171 = vector.extract_strided_slice %166 {offsets = [0, 0], sizes = [1, 32], strides = [1, 1]} : vector<8x32xf32> to vector<1x32xf32>
    %172 = vector.broadcast %171 : vector<1x32xf32> to vector<16x32xf32>
    %173 = arith.addf %170, %172 : vector<16x32xf32>
    %174 = arith.addf %173, %0 : vector<16x32xf32>
    %175 = vector.extract_strided_slice %166 {offsets = [1, 0], sizes = [1, 32], strides = [1, 1]} : vector<8x32xf32> to vector<1x32xf32>
    %176 = vector.extract_strided_slice %166 {offsets = [2, 0], sizes = [1, 32], strides = [1, 1]} : vector<8x32xf32> to vector<1x32xf32>
    %cst_63 = arith.constant dense<0.000000e+00> : vector<16xf32>
    %177 = vector.multi_reduction <add>, %174, %cst_63 [1] : vector<16x32xf32> to vector<16xf32>
    %178 = vector.shape_cast %177 : vector<16xf32> to vector<16x1xf32>
    %cst_64 = arith.constant 3.200000e+01 : f32
    %179 = vector.broadcast %cst_64 : f32 to vector<16x1xf32>
    %180 = arith.divf %178, %179 : vector<16x1xf32>
    %181 = vector.broadcast %180 : vector<16x1xf32> to vector<16x32xf32>
    %182 = arith.subf %174, %181 : vector<16x32xf32>
    %183 = arith.mulf %182, %182 : vector<16x32xf32>
    %cst_65 = arith.constant dense<0.000000e+00> : vector<16xf32>
    %184 = vector.multi_reduction <add>, %183, %cst_65 [1] : vector<16x32xf32> to vector<16xf32>
    %185 = vector.shape_cast %184 : vector<16xf32> to vector<16x1xf32>
    %cst_66 = arith.constant 3.200000e+01 : f32
    %186 = vector.broadcast %cst_66 : f32 to vector<16x1xf32>
    %187 = arith.divf %185, %186 : vector<16x1xf32>
    %188 = vector.broadcast %180 : vector<16x1xf32> to vector<16x32xf32>
    %189 = arith.subf %174, %188 : vector<16x32xf32>
    %cst_67 = arith.constant 9.99999974E-6 : f32
    %190 = vector.broadcast %cst_67 : f32 to vector<16x1xf32>
    %191 = arith.addf %187, %190 : vector<16x1xf32>
    %192 = math.rsqrt %191 : vector<16x1xf32>
    %193 = vector.broadcast %192 : vector<16x1xf32> to vector<16x32xf32>
    %194 = arith.mulf %189, %193 : vector<16x32xf32>
    %195 = vector.broadcast %175 : vector<1x32xf32> to vector<16x32xf32>
    %196 = arith.mulf %194, %195 : vector<16x32xf32>
    %197 = vector.broadcast %176 : vector<1x32xf32> to vector<16x32xf32>
    %198 = arith.addf %196, %197 : vector<16x32xf32>
    %199 = arith.truncf %198 : vector<16x32xf32> to vector<16x32xbf16>
    %c0_68 = arith.constant 0 : index
    %c0_69 = arith.constant 0 : index
    %200 = vector.load %arg6[%c0_68, %c0_69] : memref<32x128xbf16, #tpu.memory_space<vmem>>, vector<32x128xbf16>
    %cst_70 = arith.constant dense<0.000000e+00> : vector<16x128xf32>
    %201 = tpu.matmul %199, %200, %cst_70 {dimension_numbers = #tpu.dot_dimension_numbers<[1], [0], [0], [1], [0, 0, 1, 1], [], []>} : vector<16x32xbf16>, vector<32x128xbf16>, vector<16x128xf32> -> vector<16x128xf32>
    %c0_71 = arith.constant 0 : index
    %c0_72 = arith.constant 0 : index
    %202 = vector.load %arg7[%c0_71, %c0_72] : memref<1x128xf32, #tpu.memory_space<vmem>>, vector<1x128xf32>
    %203 = vector.broadcast %202 : vector<1x128xf32> to vector<16x128xf32>
    %204 = arith.addf %201, %203 : vector<16x128xf32>
    %cst_73 = arith.constant 0.000000e+00 : f32
    %205 = vector.broadcast %cst_73 : f32 to vector<16x128xf32>
    %206 = arith.maximumf %204, %205 : vector<16x128xf32>
    %207 = arith.truncf %206 : vector<16x128xf32> to vector<16x128xbf16>
    %c0_74 = arith.constant 0 : index
    %c0_75 = arith.constant 0 : index
    %208 = vector.load %arg8[%c0_74, %c0_75] : memref<128x32xbf16, #tpu.memory_space<vmem>>, vector<128x32xbf16>
    %cst_76 = arith.constant dense<0.000000e+00> : vector<16x32xf32>
    %209 = tpu.matmul %207, %208, %cst_76 {dimension_numbers = #tpu.dot_dimension_numbers<[1], [0], [0], [1], [0, 0, 1, 1], [], []>} : vector<16x128xbf16>, vector<128x32xbf16>, vector<16x32xf32> -> vector<16x32xf32>
    %210 = vector.extract_strided_slice %166 {offsets = [3, 0], sizes = [1, 32], strides = [1, 1]} : vector<8x32xf32> to vector<1x32xf32>
    %211 = vector.broadcast %210 : vector<1x32xf32> to vector<16x32xf32>
    %212 = arith.addf %209, %211 : vector<16x32xf32>
    %213 = arith.addf %212, %198 : vector<16x32xf32>
    %214 = vector.extract_strided_slice %166 {offsets = [4, 0], sizes = [1, 32], strides = [1, 1]} : vector<8x32xf32> to vector<1x32xf32>
    %215 = vector.extract_strided_slice %166 {offsets = [5, 0], sizes = [1, 32], strides = [1, 1]} : vector<8x32xf32> to vector<1x32xf32>
    %cst_77 = arith.constant dense<0.000000e+00> : vector<16xf32>
    %216 = vector.multi_reduction <add>, %213, %cst_77 [1] : vector<16x32xf32> to vector<16xf32>
    %217 = vector.shape_cast %216 : vector<16xf32> to vector<16x1xf32>
    %cst_78 = arith.constant 3.200000e+01 : f32
    %218 = vector.broadcast %cst_78 : f32 to vector<16x1xf32>
    %219 = arith.divf %217, %218 : vector<16x1xf32>
    %220 = vector.broadcast %219 : vector<16x1xf32> to vector<16x32xf32>
    %221 = arith.subf %213, %220 : vector<16x32xf32>
    %222 = arith.mulf %221, %221 : vector<16x32xf32>
    %cst_79 = arith.constant dense<0.000000e+00> : vector<16xf32>
    %223 = vector.multi_reduction <add>, %222, %cst_79 [1] : vector<16x32xf32> to vector<16xf32>
    %224 = vector.shape_cast %223 : vector<16xf32> to vector<16x1xf32>
    %cst_80 = arith.constant 3.200000e+01 : f32
    %225 = vector.broadcast %cst_80 : f32 to vector<16x1xf32>
    %226 = arith.divf %224, %225 : vector<16x1xf32>
    %227 = vector.broadcast %219 : vector<16x1xf32> to vector<16x32xf32>
    %228 = arith.subf %213, %227 : vector<16x32xf32>
    %cst_81 = arith.constant 9.99999974E-6 : f32
    %229 = vector.broadcast %cst_81 : f32 to vector<16x1xf32>
    %230 = arith.addf %226, %229 : vector<16x1xf32>
    %231 = math.rsqrt %230 : vector<16x1xf32>
    %232 = vector.broadcast %231 : vector<16x1xf32> to vector<16x32xf32>
    %233 = arith.mulf %228, %232 : vector<16x32xf32>
    %234 = vector.broadcast %214 : vector<1x32xf32> to vector<16x32xf32>
    %235 = arith.mulf %233, %234 : vector<16x32xf32>
    %236 = vector.broadcast %215 : vector<1x32xf32> to vector<16x32xf32>
    %237 = arith.addf %235, %236 : vector<16x32xf32>
    %c0_82 = arith.constant 0 : index
    %c0_83 = arith.constant 0 : index
    %238 = vector.load %arg9[%c0_82, %c0_83] : memref<16x32xf32, #tpu.memory_space<vmem>>, vector<16x32xf32>
    tpu.vector_store %arg9[%c0_82, %c0_83], %237 {strides = array<i32>} : memref<16x32xf32, #tpu.memory_space<vmem>>, vector<16x32xf32>,
    return
  }
  func.func @transform_0(%arg0: i32) -> (i32, i32) {
    %c0_i32 = arith.constant 0 : i32
    %c0_i32_0 = arith.constant 0 : i32
    return %arg0, %c0_i32 : i32, i32
  }
  func.func @transform_1(%arg0: i32) -> (i32, i32) {
    %c0_i32 = arith.constant 0 : i32
    %c0_i32_0 = arith.constant 0 : i32
    return %arg0, %c0_i32 : i32, i32
  }
  func.func @transform_2(%arg0: i32) -> (i32, i32) {
    %c0_i32 = arith.constant 0 : i32
    %c0_i32_0 = arith.constant 0 : i32
    %c0_i32_1 = arith.constant 0 : i32
    return %c0_i32, %c0_i32_0 : i32, i32
  }
  func.func @transform_3(%arg0: i32) -> (i32, i32) {
    %c0_i32 = arith.constant 0 : i32
    %c0_i32_0 = arith.constant 0 : i32
    %c0_i32_1 = arith.constant 0 : i32
    return %c0_i32, %c0_i32_0 : i32, i32
  }
  func.func @transform_4(%arg0: i32) -> (i32, i32) {
    %c0_i32 = arith.constant 0 : i32
    %c0_i32_0 = arith.constant 0 : i32
    %c0_i32_1 = arith.constant 0 : i32
    return %c0_i32, %c0_i32_0 : i32, i32
  }
  func.func @transform_5(%arg0: i32) -> (i32, i32) {
    %c0_i32 = arith.constant 0 : i32
    %c0_i32_0 = arith.constant 0 : i32
    %c0_i32_1 = arith.constant 0 : i32
    return %c0_i32, %c0_i32_0 : i32, i32
  }
  func.func @transform_6(%arg0: i32) -> (i32, i32) {
    %c0_i32 = arith.constant 0 : i32
    %c0_i32_0 = arith.constant 0 : i32
    %c0_i32_1 = arith.constant 0 : i32
    return %c0_i32, %c0_i32_0 : i32, i32
  }
  func.func @transform_7(%arg0: i32) -> (i32, i32) {
    %c0_i32 = arith.constant 0 : i32
    %c0_i32_0 = arith.constant 0 : i32
    %c0_i32_1 = arith.constant 0 : i32
    return %c0_i32, %c0_i32_0 : i32, i32
  }
  func.func @transform_8(%arg0: i32) -> (i32, i32) {
    %c0_i32 = arith.constant 0 : i32
    %c0_i32_0 = arith.constant 0 : i32
    return %arg0, %c0_i32 : i32, i32
  }
}

module attributes {stable_mosaic.version = 11 : i64} {
  func.func @transformer_block_kernel(%arg0: i32, %arg1: memref<16x32xf32, #tpu.memory_space<vmem>>, %arg2: memref<2x8xf32, #tpu.memory_space<vmem>>, %arg3: memref<96x32xbf16, #tpu.memory_space<vmem>>, %arg4: memref<32x32xbf16, #tpu.memory_space<vmem>>, %arg5: memref<8x32xf32, #tpu.memory_space<vmem>>, %arg6: memref<32x128xbf16, #tpu.memory_space<vmem>>, %arg7: memref<1x128xf32, #tpu.memory_space<vmem>>, %arg8: memref<128x32xbf16, #tpu.memory_space<vmem>>, %arg9: memref<16x32xf32, #tpu.memory_space<vmem>>, %arg10: memref<16x32xf32, #tpu.memory_space<vmem>>) attributes {dimension_semantics = [#tpu.dimension_semantics<parallel>], iteration_bounds = array<i64: 1>, scalar_prefetch = 0 : i64, scratch_operands = 1 : i64, tpu.core_type = #tpu.core_type<tc>, window_params = [{transform_indices = @transform_0, window_bounds = array<i64: 16, 32>}, {transform_indices = @transform_1, window_bounds = array<i64: 2, 8>}, {pipeline_mode = #tpu.pipeline_mode<synchronous>, transform_indices = @transform_2, window_bounds = array<i64: 96, 32>}, {pipeline_mode = #tpu.pipeline_mode<synchronous>, transform_indices = @transform_3, window_bounds = array<i64: 32, 32>}, {pipeline_mode = #tpu.pipeline_mode<synchronous>, transform_indices = @transform_4, window_bounds = array<i64: 8, 32>}, {pipeline_mode = #tpu.pipeline_mode<synchronous>, transform_indices = @transform_5, window_bounds = array<i64: 32, 128>}, {pipeline_mode = #tpu.pipeline_mode<synchronous>, transform_indices = @transform_6, window_bounds = array<i64: 1, 128>}, {pipeline_mode = #tpu.pipeline_mode<synchronous>, transform_indices = @transform_7, window_bounds = array<i64: 128, 32>}, {transform_indices = @transform_8, window_bounds = array<i64: 16, 32>}]} {
    %c0 = arith.constant 0 : index
    %c0_0 = arith.constant 0 : index
    %0 = vector.load %arg1[%c0, %c0_0] : memref<16x32xf32, #tpu.memory_space<vmem>>, vector<16x32xf32>
    %c0_1 = arith.constant 0 : index
    %c0_2 = arith.constant 0 : index
    %1 = vector.load %arg3[%c0_1, %c0_2] : memref<96x32xbf16, #tpu.memory_space<vmem>>, vector<96x32xbf16>
    %2 = arith.truncf %0 : vector<16x32xf32> to vector<16x32xbf16>
    %cst = arith.constant dense<0.000000e+00> : vector<96x16xf32>
    %3 = tpu.matmul %1, %2, %cst {dimension_numbers = #tpu.dot_dimension_numbers<[1], [1], [0], [0], [0, 0, 1, 0], [], []>} : vector<96x32xbf16>, vector<16x32xbf16>, vector<96x16xf32> -> vector<96x16xf32>
    %4 = arith.truncf %3 : vector<96x16xf32> to vector<96x16xbf16>
    %c0_3 = arith.constant 0 : index
    %c0_4 = arith.constant 0 : index
    %5 = vector.load %arg2[%c0_3, %c0_4] : memref<2x8xf32, #tpu.memory_space<vmem>>, vector<2x8xf32>
    %6 = vector.extract_strided_slice %5 {offsets = [0, 0], sizes = [1, 8], strides = [1, 1]} : vector<2x8xf32> to vector<1x8xf32>
    %cst_5 = arith.constant 0.000000e+00 : f32
    %7 = vector.broadcast %cst_5 : f32 to vector<1x8xf32>
    %8 = arith.cmpf oeq, %6, %7 : vector<1x8xf32>
    %cst_6 = arith.constant -1.76776698E+19 : f32
    %cst_7 = arith.constant 0.000000e+00 : f32
    %9 = vector.broadcast %cst_6 : f32 to vector<1x8xf32>
    %10 = vector.broadcast %cst_7 : f32 to vector<1x8xf32>
    %11 = arith.select %8, %9, %10 : vector<1x8xi1>, vector<1x8xf32>
    %12 = vector.shape_cast %11 : vector<1x8xf32> to vector<1x8xf32>
    %13 = vector.broadcast %12 : vector<1x8xf32> to vector<8x8xf32>
    %14 = vector.extract_strided_slice %4 {offsets = [0, 0], sizes = [8, 8], strides = [1, 1]} : vector<96x16xbf16> to vector<8x8xbf16>
    %15 = vector.extract_strided_slice %4 {offsets = [32, 0], sizes = [8, 8], strides = [1, 1]} : vector<96x16xbf16> to vector<8x8xbf16>
    %16 = vector.extract_strided_slice %4 {offsets = [64, 0], sizes = [8, 8], strides = [1, 1]} : vector<96x16xbf16> to vector<8x8xbf16>
    %cst_8 = arith.constant dense<0.000000e+00> : vector<8x8xf32>
    %17 = tpu.matmul %14, %15, %cst_8 {dimension_numbers = #tpu.dot_dimension_numbers<[0], [0], [1], [1], [0, 1, 1, 1], [], []>} : vector<8x8xbf16>, vector<8x8xbf16>, vector<8x8xf32> -> vector<8x8xf32>
    %18 = arith.addf %17, %13 : vector<8x8xf32>
    %cst_9 = arith.constant dense<0xFF800000> : vector<8xf32>
    %19 = vector.multi_reduction <maximumf>, %18, %cst_9 [1] : vector<8x8xf32> to vector<8xf32>
    %20 = vector.shape_cast %19 : vector<8xf32> to vector<8x1xf32>
    %21 = vector.broadcast %20 : vector<8x1xf32> to vector<8x8xf32>
    %22 = arith.subf %18, %21 : vector<8x8xf32>
    %23 = math.exp %22 : vector<8x8xf32>
    %cst_10 = arith.constant dense<0.000000e+00> : vector<8xf32>
    %24 = vector.multi_reduction <add>, %23, %cst_10 [1] : vector<8x8xf32> to vector<8xf32>
    %25 = vector.shape_cast %24 : vector<8xf32> to vector<8x1xf32>
    %26 = tpu.reciprocal %25 {approx = true} : vector<8x1xf32> -> vector<8x1xf32>
    %27 = vector.broadcast %26 : vector<8x1xf32> to vector<8x8xf32>
    %28 = arith.mulf %23, %27 : vector<8x8xf32>
    %29 = arith.truncf %28 : vector<8x8xf32> to vector<8x8xbf16>
    %cst_11 = arith.constant dense<0.000000e+00> : vector<8x8xf32>
    %30 = tpu.matmul %29, %16, %cst_11 {dimension_numbers = #tpu.dot_dimension_numbers<[1], [1], [0], [0], [0, 0, 1, 0], [], []>} : vector<8x8xbf16>, vector<8x8xbf16>, vector<8x8xf32> -> vector<8x8xf32>
    %c0_12 = arith.constant 0 : index
    %c0_13 = arith.constant 0 : index
    %31 = vector.load %arg10[%c0_12, %c0_13] : memref<16x32xf32, #tpu.memory_space<vmem>>, vector<8x8xf32>
    tpu.vector_store %arg10[%c0_12, %c0_13], %30 {strides = array<i32>} : memref<16x32xf32, #tpu.memory_space<vmem>>, vector<8x8xf32>,
    %32 = vector.extract_strided_slice %4 {offsets = [8, 0], sizes = [8, 8], strides = [1, 1]} : vector<96x16xbf16> to vector<8x8xbf16>
    %33 = vector.extract_strided_slice %4 {offsets = [40, 0], sizes = [8, 8], strides = [1, 1]} : vector<96x16xbf16> to vector<8x8xbf16>
    %34 = vector.extract_strided_slice %4 {offsets = [72, 0], sizes = [8, 8], strides = [1, 1]} : vector<96x16xbf16> to vector<8x8xbf16>
    %cst_14 = arith.constant dense<0.000000e+00> : vector<8x8xf32>
    %35 = tpu.matmul %32, %33, %cst_14 {dimension_numbers = #tpu.dot_dimension_numbers<[0], [0], [1], [1], [0, 1, 1, 1], [], []>} : vector<8x8xbf16>, vector<8x8xbf16>, vector<8x8xf32> -> vector<8x8xf32>
    %36 = arith.addf %35, %13 : vector<8x8xf32>
    %cst_15 = arith.constant dense<0xFF800000> : vector<8xf32>
    %37 = vector.multi_reduction <maximumf>, %36, %cst_15 [1] : vector<8x8xf32> to vector<8xf32>
    %38 = vector.shape_cast %37 : vector<8xf32> to vector<8x1xf32>
    %39 = vector.broadcast %38 : vector<8x1xf32> to vector<8x8xf32>
    %40 = arith.subf %36, %39 : vector<8x8xf32>
    %41 = math.exp %40 : vector<8x8xf32>
    %cst_16 = arith.constant dense<0.000000e+00> : vector<8xf32>
    %42 = vector.multi_reduction <add>, %41, %cst_16 [1] : vector<8x8xf32> to vector<8xf32>
    %43 = vector.shape_cast %42 : vector<8xf32> to vector<8x1xf32>
    %44 = tpu.reciprocal %43 {approx = true} : vector<8x1xf32> -> vector<8x1xf32>
    %45 = vector.broadcast %44 : vector<8x1xf32> to vector<8x8xf32>
    %46 = arith.mulf %41, %45 : vector<8x8xf32>
    %47 = arith.truncf %46 : vector<8x8xf32> to vector<8x8xbf16>
    %cst_17 = arith.constant dense<0.000000e+00> : vector<8x8xf32>
    %48 = tpu.matmul %47, %34, %cst_17 {dimension_numbers = #tpu.dot_dimension_numbers<[1], [1], [0], [0], [0, 0, 1, 0], [], []>} : vector<8x8xbf16>, vector<8x8xbf16>, vector<8x8xf32> -> vector<8x8xf32>
    %c0_18 = arith.constant 0 : index
    %c8 = arith.constant 8 : index
    %49 = vector.load %arg10[%c0_18, %c8] : memref<16x32xf32, #tpu.memory_space<vmem>>, vector<8x8xf32>
    tpu.vector_store %arg10[%c0_18, %c8], %48 {strides = array<i32>} : memref<16x32xf32, #tpu.memory_space<vmem>>, vector<8x8xf32>,
    %50 = vector.extract_strided_slice %4 {offsets = [16, 0], sizes = [8, 8], strides = [1, 1]} : vector<96x16xbf16> to vector<8x8xbf16>
    %51 = vector.extract_strided_slice %4 {offsets = [48, 0], sizes = [8, 8], strides = [1, 1]} : vector<96x16xbf16> to vector<8x8xbf16>
    %52 = vector.extract_strided_slice %4 {offsets = [80, 0], sizes = [8, 8], strides = [1, 1]} : vector<96x16xbf16> to vector<8x8xbf16>
    %cst_19 = arith.constant dense<0.000000e+00> : vector<8x8xf32>
    %53 = tpu.matmul %50, %51, %cst_19 {dimension_numbers = #tpu.dot_dimension_numbers<[0], [0], [1], [1], [0, 1, 1, 1], [], []>} : vector<8x8xbf16>, vector<8x8xbf16>, vector<8x8xf32> -> vector<8x8xf32>
    %54 = arith.addf %53, %13 : vector<8x8xf32>
    %cst_20 = arith.constant dense<0xFF800000> : vector<8xf32>
    %55 = vector.multi_reduction <maximumf>, %54, %cst_20 [1] : vector<8x8xf32> to vector<8xf32>
    %56 = vector.shape_cast %55 : vector<8xf32> to vector<8x1xf32>
    %57 = vector.broadcast %56 : vector<8x1xf32> to vector<8x8xf32>
    %58 = arith.subf %54, %57 : vector<8x8xf32>
    %59 = math.exp %58 : vector<8x8xf32>
    %cst_21 = arith.constant dense<0.000000e+00> : vector<8xf32>
    %60 = vector.multi_reduction <add>, %59, %cst_21 [1] : vector<8x8xf32> to vector<8xf32>
    %61 = vector.shape_cast %60 : vector<8xf32> to vector<8x1xf32>
    %62 = tpu.reciprocal %61 {approx = true} : vector<8x1xf32> -> vector<8x1xf32>
    %63 = vector.broadcast %62 : vector<8x1xf32> to vector<8x8xf32>
    %64 = arith.mulf %59, %63 : vector<8x8xf32>
    %65 = arith.truncf %64 : vector<8x8xf32> to vector<8x8xbf16>
    %cst_22 = arith.constant dense<0.000000e+00> : vector<8x8xf32>
    %66 = tpu.matmul %65, %52, %cst_22 {dimension_numbers = #tpu.dot_dimension_numbers<[1], [1], [0], [0], [0, 0, 1, 0], [], []>} : vector<8x8xbf16>, vector<8x8xbf16>, vector<8x8xf32> -> vector<8x8xf32>
    %c0_23 = arith.constant 0 : index
    %c16 = arith.constant 16 : index
    %67 = vector.load %arg10[%c0_23, %c16] : memref<16x32xf32, #tpu.memory_space<vmem>>, vector<8x8xf32>
    tpu.vector_store %arg10[%c0_23, %c16], %66 {strides = array<i32>} : memref<16x32xf32, #tpu.memory_space<vmem>>, vector<8x8xf32>,
    %68 = vector.extract_strided_slice %4 {offsets = [24, 0], sizes = [8, 8], strides = [1, 1]} : vector<96x16xbf16> to vector<8x8xbf16>
    %69 = vector.extract_strided_slice %4 {offsets = [56, 0], sizes = [8, 8], strides = [1, 1]} : vector<96x16xbf16> to vector<8x8xbf16>
    %70 = vector.extract_strided_slice %4 {offsets = [88, 0], sizes = [8, 8], strides = [1, 1]} : vector<96x16xbf16> to vector<8x8xbf16>
    %cst_24 = arith.constant dense<0.000000e+00> : vector<8x8xf32>
    %71 = tpu.matmul %68, %69, %cst_24 {dimension_numbers = #tpu.dot_dimension_numbers<[0], [0], [1], [1], [0, 1, 1, 1], [], []>} : vector<8x8xbf16>, vector<8x8xbf16>, vector<8x8xf32> -> vector<8x8xf32>
    %72 = arith.addf %71, %13 : vector<8x8xf32>
    %cst_25 = arith.constant dense<0xFF800000> : vector<8xf32>
    %73 = vector.multi_reduction <maximumf>, %72, %cst_25 [1] : vector<8x8xf32> to vector<8xf32>
    %74 = vector.shape_cast %73 : vector<8xf32> to vector<8x1xf32>
    %75 = vector.broadcast %74 : vector<8x1xf32> to vector<8x8xf32>
    %76 = arith.subf %72, %75 : vector<8x8xf32>
    %77 = math.exp %76 : vector<8x8xf32>
    %cst_26 = arith.constant dense<0.000000e+00> : vector<8xf32>
    %78 = vector.multi_reduction <add>, %77, %cst_26 [1] : vector<8x8xf32> to vector<8xf32>
    %79 = vector.shape_cast %78 : vector<8xf32> to vector<8x1xf32>
    %80 = tpu.reciprocal %79 {approx = true} : vector<8x1xf32> -> vector<8x1xf32>
    %81 = vector.broadcast %80 : vector<8x1xf32> to vector<8x8xf32>
    %82 = arith.mulf %77, %81 : vector<8x8xf32>
    %83 = arith.truncf %82 : vector<8x8xf32> to vector<8x8xbf16>
    %cst_27 = arith.constant dense<0.000000e+00> : vector<8x8xf32>
    %84 = tpu.matmul %83, %70, %cst_27 {dimension_numbers = #tpu.dot_dimension_numbers<[1], [1], [0], [0], [0, 0, 1, 0], [], []>} : vector<8x8xbf16>, vector<8x8xbf16>, vector<8x8xf32> -> vector<8x8xf32>
    %c0_28 = arith.constant 0 : index
    %c24 = arith.constant 24 : index
    %85 = vector.load %arg10[%c0_28, %c24] : memref<16x32xf32, #tpu.memory_space<vmem>>, vector<8x8xf32>
    tpu.vector_store %arg10[%c0_28, %c24], %84 {strides = array<i32>} : memref<16x32xf32, #tpu.memory_space<vmem>>, vector<8x8xf32>,
    %86 = vector.extract_strided_slice %5 {offsets = [1, 0], sizes = [1, 8], strides = [1, 1]} : vector<2x8xf32> to vector<1x8xf32>
    %cst_29 = arith.constant 0.000000e+00 : f32
    %87 = vector.broadcast %cst_29 : f32 to vector<1x8xf32>
    %88 = arith.cmpf oeq, %86, %87 : vector<1x8xf32>
    %cst_30 = arith.constant -1.76776698E+19 : f32
    %cst_31 = arith.constant 0.000000e+00 : f32
    %89 = vector.broadcast %cst_30 : f32 to vector<1x8xf32>
    %90 = vector.broadcast %cst_31 : f32 to vector<1x8xf32>
    %91 = arith.select %88, %89, %90 : vector<1x8xi1>, vector<1x8xf32>
    %92 = vector.shape_cast %91 : vector<1x8xf32> to vector<1x8xf32>
    %93 = vector.broadcast %92 : vector<1x8xf32> to vector<8x8xf32>
    %94 = vector.extract_strided_slice %4 {offsets = [0, 8], sizes = [8, 8], strides = [1, 1]} : vector<96x16xbf16> to vector<8x8xbf16>
    %95 = vector.extract_strided_slice %4 {offsets = [32, 8], sizes = [8, 8], strides = [1, 1]} : vector<96x16xbf16> to vector<8x8xbf16>
    %96 = vector.extract_strided_slice %4 {offsets = [64, 8], sizes = [8, 8], strides = [1, 1]} : vector<96x16xbf16> to vector<8x8xbf16>
    %cst_32 = arith.constant dense<0.000000e+00> : vector<8x8xf32>
    %97 = tpu.matmul %94, %95, %cst_32 {dimension_numbers = #tpu.dot_dimension_numbers<[0], [0], [1], [1], [0, 1, 1, 1], [], []>} : vector<8x8xbf16>, vector<8x8xbf16>, vector<8x8xf32> -> vector<8x8xf32>
    %98 = arith.addf %97, %93 : vector<8x8xf32>
    %cst_33 = arith.constant dense<0xFF800000> : vector<8xf32>
    %99 = vector.multi_reduction <maximumf>, %98, %cst_33 [1] : vector<8x8xf32> to vector<8xf32>
    %100 = vector.shape_cast %99 : vector<8xf32> to vector<8x1xf32>
    %101 = vector.broadcast %100 : vector<8x1xf32> to vector<8x8xf32>
    %102 = arith.subf %98, %101 : vector<8x8xf32>
    %103 = math.exp %102 : vector<8x8xf32>
    %cst_34 = arith.constant dense<0.000000e+00> : vector<8xf32>
    %104 = vector.multi_reduction <add>, %103, %cst_34 [1] : vector<8x8xf32> to vector<8xf32>
    %105 = vector.shape_cast %104 : vector<8xf32> to vector<8x1xf32>
    %106 = tpu.reciprocal %105 {approx = true} : vector<8x1xf32> -> vector<8x1xf32>
    %107 = vector.broadcast %106 : vector<8x1xf32> to vector<8x8xf32>
    %108 = arith.mulf %103, %107 : vector<8x8xf32>
    %109 = arith.truncf %108 : vector<8x8xf32> to vector<8x8xbf16>
    %cst_35 = arith.constant dense<0.000000e+00> : vector<8x8xf32>
    %110 = tpu.matmul %109, %96, %cst_35 {dimension_numbers = #tpu.dot_dimension_numbers<[1], [1], [0], [0], [0, 0, 1, 0], [], []>} : vector<8x8xbf16>, vector<8x8xbf16>, vector<8x8xf32> -> vector<8x8xf32>
    %c8_36 = arith.constant 8 : index
    %c0_37 = arith.constant 0 : index
    %111 = vector.load %arg10[%c8_36, %c0_37] : memref<16x32xf32, #tpu.memory_space<vmem>>, vector<8x8xf32>
    tpu.vector_store %arg10[%c8_36, %c0_37], %110 {strides = array<i32>} : memref<16x32xf32, #tpu.memory_space<vmem>>, vector<8x8xf32>,
    %112 = vector.extract_strided_slice %4 {offsets = [8, 8], sizes = [8, 8], strides = [1, 1]} : vector<96x16xbf16> to vector<8x8xbf16>
    %113 = vector.extract_strided_slice %4 {offsets = [40, 8], sizes = [8, 8], strides = [1, 1]} : vector<96x16xbf16> to vector<8x8xbf16>
    %114 = vector.extract_strided_slice %4 {offsets = [72, 8], sizes = [8, 8], strides = [1, 1]} : vector<96x16xbf16> to vector<8x8xbf16>
    %cst_38 = arith.constant dense<0.000000e+00> : vector<8x8xf32>
    %115 = tpu.matmul %112, %113, %cst_38 {dimension_numbers = #tpu.dot_dimension_numbers<[0], [0], [1], [1], [0, 1, 1, 1], [], []>} : vector<8x8xbf16>, vector<8x8xbf16>, vector<8x8xf32> -> vector<8x8xf32>
    %116 = arith.addf %115, %93 : vector<8x8xf32>
    %cst_39 = arith.constant dense<0xFF800000> : vector<8xf32>
    %117 = vector.multi_reduction <maximumf>, %116, %cst_39 [1] : vector<8x8xf32> to vector<8xf32>
    %118 = vector.shape_cast %117 : vector<8xf32> to vector<8x1xf32>
    %119 = vector.broadcast %118 : vector<8x1xf32> to vector<8x8xf32>
    %120 = arith.subf %116, %119 : vector<8x8xf32>
    %121 = math.exp %120 : vector<8x8xf32>
    %cst_40 = arith.constant dense<0.000000e+00> : vector<8xf32>
    %122 = vector.multi_reduction <add>, %121, %cst_40 [1] : vector<8x8xf32> to vector<8xf32>
    %123 = vector.shape_cast %122 : vector<8xf32> to vector<8x1xf32>
    %124 = tpu.reciprocal %123 {approx = true} : vector<8x1xf32> -> vector<8x1xf32>
    %125 = vector.broadcast %124 : vector<8x1xf32> to vector<8x8xf32>
    %126 = arith.mulf %121, %125 : vector<8x8xf32>
    %127 = arith.truncf %126 : vector<8x8xf32> to vector<8x8xbf16>
    %cst_41 = arith.constant dense<0.000000e+00> : vector<8x8xf32>
    %128 = tpu.matmul %127, %114, %cst_41 {dimension_numbers = #tpu.dot_dimension_numbers<[1], [1], [0], [0], [0, 0, 1, 0], [], []>} : vector<8x8xbf16>, vector<8x8xbf16>, vector<8x8xf32> -> vector<8x8xf32>
    %c8_42 = arith.constant 8 : index
    %c8_43 = arith.constant 8 : index
    %129 = vector.load %arg10[%c8_42, %c8_43] : memref<16x32xf32, #tpu.memory_space<vmem>>, vector<8x8xf32>
    tpu.vector_store %arg10[%c8_42, %c8_43], %128 {strides = array<i32>} : memref<16x32xf32, #tpu.memory_space<vmem>>, vector<8x8xf32>,
    %130 = vector.extract_strided_slice %4 {offsets = [16, 8], sizes = [8, 8], strides = [1, 1]} : vector<96x16xbf16> to vector<8x8xbf16>
    %131 = vector.extract_strided_slice %4 {offsets = [48, 8], sizes = [8, 8], strides = [1, 1]} : vector<96x16xbf16> to vector<8x8xbf16>
    %132 = vector.extract_strided_slice %4 {offsets = [80, 8], sizes = [8, 8], strides = [1, 1]} : vector<96x16xbf16> to vector<8x8xbf16>
    %cst_44 = arith.constant dense<0.000000e+00> : vector<8x8xf32>
    %133 = tpu.matmul %130, %131, %cst_44 {dimension_numbers = #tpu.dot_dimension_numbers<[0], [0], [1], [1], [0, 1, 1, 1], [], []>} : vector<8x8xbf16>, vector<8x8xbf16>, vector<8x8xf32> -> vector<8x8xf32>
    %134 = arith.addf %133, %93 : vector<8x8xf32>
    %cst_45 = arith.constant dense<0xFF800000> : vector<8xf32>
    %135 = vector.multi_reduction <maximumf>, %134, %cst_45 [1] : vector<8x8xf32> to vector<8xf32>
    %136 = vector.shape_cast %135 : vector<8xf32> to vector<8x1xf32>
    %137 = vector.broadcast %136 : vector<8x1xf32> to vector<8x8xf32>
    %138 = arith.subf %134, %137 : vector<8x8xf32>
    %139 = math.exp %138 : vector<8x8xf32>
    %cst_46 = arith.constant dense<0.000000e+00> : vector<8xf32>
    %140 = vector.multi_reduction <add>, %139, %cst_46 [1] : vector<8x8xf32> to vector<8xf32>
    %141 = vector.shape_cast %140 : vector<8xf32> to vector<8x1xf32>
    %142 = tpu.reciprocal %141 {approx = true} : vector<8x1xf32> -> vector<8x1xf32>
    %143 = vector.broadcast %142 : vector<8x1xf32> to vector<8x8xf32>
    %144 = arith.mulf %139, %143 : vector<8x8xf32>
    %145 = arith.truncf %144 : vector<8x8xf32> to vector<8x8xbf16>
    %cst_47 = arith.constant dense<0.000000e+00> : vector<8x8xf32>
    %146 = tpu.matmul %145, %132, %cst_47 {dimension_numbers = #tpu.dot_dimension_numbers<[1], [1], [0], [0], [0, 0, 1, 0], [], []>} : vector<8x8xbf16>, vector<8x8xbf16>, vector<8x8xf32> -> vector<8x8xf32>
    %c8_48 = arith.constant 8 : index
    %c16_49 = arith.constant 16 : index
    %147 = vector.load %arg10[%c8_48, %c16_49] : memref<16x32xf32, #tpu.memory_space<vmem>>, vector<8x8xf32>
    tpu.vector_store %arg10[%c8_48, %c16_49], %146 {strides = array<i32>} : memref<16x32xf32, #tpu.memory_space<vmem>>, vector<8x8xf32>,
    %148 = vector.extract_strided_slice %4 {offsets = [24, 8], sizes = [8, 8], strides = [1, 1]} : vector<96x16xbf16> to vector<8x8xbf16>
    %149 = vector.extract_strided_slice %4 {offsets = [56, 8], sizes = [8, 8], strides = [1, 1]} : vector<96x16xbf16> to vector<8x8xbf16>
    %150 = vector.extract_strided_slice %4 {offsets = [88, 8], sizes = [8, 8], strides = [1, 1]} : vector<96x16xbf16> to vector<8x8xbf16>
    %cst_50 = arith.constant dense<0.000000e+00> : vector<8x8xf32>
    %151 = tpu.matmul %148, %149, %cst_50 {dimension_numbers = #tpu.dot_dimension_numbers<[0], [0], [1], [1], [0, 1, 1, 1], [], []>} : vector<8x8xbf16>, vector<8x8xbf16>, vector<8x8xf32> -> vector<8x8xf32>
    %152 = arith.addf %151, %93 : vector<8x8xf32>
    %cst_51 = arith.constant dense<0xFF800000> : vector<8xf32>
    %153 = vector.multi_reduction <maximumf>, %152, %cst_51 [1] : vector<8x8xf32> to vector<8xf32>
    %154 = vector.shape_cast %153 : vector<8xf32> to vector<8x1xf32>
    %155 = vector.broadcast %154 : vector<8x1xf32> to vector<8x8xf32>
    %156 = arith.subf %152, %155 : vector<8x8xf32>
    %157 = math.exp %156 : vector<8x8xf32>
    %cst_52 = arith.constant dense<0.000000e+00> : vector<8xf32>
    %158 = vector.multi_reduction <add>, %157, %cst_52 [1] : vector<8x8xf32> to vector<8xf32>
    %159 = vector.shape_cast %158 : vector<8xf32> to vector<8x1xf32>
    %160 = tpu.reciprocal %159 {approx = true} : vector<8x1xf32> -> vector<8x1xf32>
    %161 = vector.broadcast %160 : vector<8x1xf32> to vector<8x8xf32>
    %162 = arith.mulf %157, %161 : vector<8x8xf32>
    %163 = arith.truncf %162 : vector<8x8xf32> to vector<8x8xbf16>
    %cst_53 = arith.constant dense<0.000000e+00> : vector<8x8xf32>
    %164 = tpu.matmul %163, %150, %cst_53 {dimension_numbers = #tpu.dot_dimension_numbers<[1], [1], [0], [0], [0, 0, 1, 0], [], []>} : vector<8x8xbf16>, vector<8x8xbf16>, vector<8x8xf32> -> vector<8x8xf32>
    %c8_54 = arith.constant 8 : index
    %c24_55 = arith.constant 24 : index
    %165 = vector.load %arg10[%c8_54, %c24_55] : memref<16x32xf32, #tpu.memory_space<vmem>>, vector<8x8xf32>
    tpu.vector_store %arg10[%c8_54, %c24_55], %164 {strides = array<i32>} : memref<16x32xf32, #tpu.memory_space<vmem>>, vector<8x8xf32>,
    %c0_56 = arith.constant 0 : index
    %c0_57 = arith.constant 0 : index
    %166 = vector.load %arg5[%c0_56, %c0_57] : memref<8x32xf32, #tpu.memory_space<vmem>>, vector<8x32xf32>
    %c0_58 = arith.constant 0 : index
    %c0_59 = arith.constant 0 : index
    %167 = vector.load %arg10[%c0_58, %c0_59] : memref<16x32xf32, #tpu.memory_space<vmem>>, vector<16x32xf32>
    %168 = arith.truncf %167 : vector<16x32xf32> to vector<16x32xbf16>
    %c0_60 = arith.constant 0 : index
    %c0_61 = arith.constant 0 : index
    %169 = vector.load %arg4[%c0_60, %c0_61] : memref<32x32xbf16, #tpu.memory_space<vmem>>, vector<32x32xbf16>
    %cst_62 = arith.constant dense<0.000000e+00> : vector<16x32xf32>
    %170 = tpu.matmul %168, %169, %cst_62 {dimension_numbers = #tpu.dot_dimension_numbers<[1], [0], [0], [1], [0, 0, 1, 1], [], []>} : vector<16x32xbf16>, vector<32x32xbf16>, vector<16x32xf32> -> vector<16x32xf32>
    %171 = vector.extract_strided_slice %166 {offsets = [0, 0], sizes = [1, 32], strides = [1, 1]} : vector<8x32xf32> to vector<1x32xf32>
    %172 = vector.broadcast %171 : vector<1x32xf32> to vector<16x32xf32>
    %173 = arith.addf %170, %172 : vector<16x32xf32>
    %174 = arith.addf %173, %0 : vector<16x32xf32>
    %175 = vector.extract_strided_slice %166 {offsets = [1, 0], sizes = [1, 32], strides = [1, 1]} : vector<8x32xf32> to vector<1x32xf32>
    %176 = vector.extract_strided_slice %166 {offsets = [2, 0], sizes = [1, 32], strides = [1, 1]} : vector<8x32xf32> to vector<1x32xf32>
    %cst_63 = arith.constant dense<0.000000e+00> : vector<16xf32>
    %177 = vector.multi_reduction <add>, %174, %cst_63 [1] : vector<16x32xf32> to vector<16xf32>
    %178 = vector.shape_cast %177 : vector<16xf32> to vector<16x1xf32>
    %cst_64 = arith.constant 3.200000e+01 : f32
    %179 = vector.broadcast %cst_64 : f32 to vector<16x1xf32>
    %180 = arith.divf %178, %179 : vector<16x1xf32>
    %181 = vector.broadcast %180 : vector<16x1xf32> to vector<16x32xf32>
    %182 = arith.subf %174, %181 : vector<16x32xf32>
    %183 = arith.mulf %182, %182 : vector<16x32xf32>
    %cst_65 = arith.constant dense<0.000000e+00> : vector<16xf32>
    %184 = vector.multi_reduction <add>, %183, %cst_65 [1] : vector<16x32xf32> to vector<16xf32>
    %185 = vector.shape_cast %184 : vector<16xf32> to vector<16x1xf32>
    %cst_66 = arith.constant 3.200000e+01 : f32
    %186 = vector.broadcast %cst_66 : f32 to vector<16x1xf32>
    %187 = arith.divf %185, %186 : vector<16x1xf32>
    %188 = vector.broadcast %180 : vector<16x1xf32> to vector<16x32xf32>
    %189 = arith.subf %174, %188 : vector<16x32xf32>
    %cst_67 = arith.constant 9.99999974E-6 : f32
    %190 = vector.broadcast %cst_67 : f32 to vector<16x1xf32>
    %191 = arith.addf %187, %190 : vector<16x1xf32>
    %192 = math.rsqrt %191 : vector<16x1xf32>
    %193 = vector.broadcast %192 : vector<16x1xf32> to vector<16x32xf32>
    %194 = arith.mulf %189, %193 : vector<16x32xf32>
    %195 = vector.broadcast %175 : vector<1x32xf32> to vector<16x32xf32>
    %196 = arith.mulf %194, %195 : vector<16x32xf32>
    %197 = vector.broadcast %176 : vector<1x32xf32> to vector<16x32xf32>
    %198 = arith.addf %196, %197 : vector<16x32xf32>
    %199 = arith.truncf %198 : vector<16x32xf32> to vector<16x32xbf16>
    %c0_68 = arith.constant 0 : index
    %c0_69 = arith.constant 0 : index
    %200 = vector.load %arg6[%c0_68, %c0_69] : memref<32x128xbf16, #tpu.memory_space<vmem>>, vector<32x128xbf16>
    %cst_70 = arith.constant dense<0.000000e+00> : vector<16x128xf32>
    %201 = tpu.matmul %199, %200, %cst_70 {dimension_numbers = #tpu.dot_dimension_numbers<[1], [0], [0], [1], [0, 0, 1, 1], [], []>} : vector<16x32xbf16>, vector<32x128xbf16>, vector<16x128xf32> -> vector<16x128xf32>
    %c0_71 = arith.constant 0 : index
    %c0_72 = arith.constant 0 : index
    %202 = vector.load %arg7[%c0_71, %c0_72] : memref<1x128xf32, #tpu.memory_space<vmem>>, vector<1x128xf32>
    %203 = vector.broadcast %202 : vector<1x128xf32> to vector<16x128xf32>
    %204 = arith.addf %201, %203 : vector<16x128xf32>
    %cst_73 = arith.constant 0.000000e+00 : f32
    %205 = vector.broadcast %cst_73 : f32 to vector<16x128xf32>
    %206 = arith.maximumf %204, %205 : vector<16x128xf32>
    %207 = arith.truncf %206 : vector<16x128xf32> to vector<16x128xbf16>
    %c0_74 = arith.constant 0 : index
    %c0_75 = arith.constant 0 : index
    %208 = vector.load %arg8[%c0_74, %c0_75] : memref<128x32xbf16, #tpu.memory_space<vmem>>, vector<128x32xbf16>
    %cst_76 = arith.constant dense<0.000000e+00> : vector<16x32xf32>
    %209 = tpu.matmul %207, %208, %cst_76 {dimension_numbers = #tpu.dot_dimension_numbers<[1], [0], [0], [1], [0, 0, 1, 1], [], []>} : vector<16x128xbf16>, vector<128x32xbf16>, vector<16x32xf32> -> vector<16x32xf32>
    %210 = vector.extract_strided_slice %166 {offsets = [3, 0], sizes = [1, 32], strides = [1, 1]} : vector<8x32xf32> to vector<1x32xf32>
    %211 = vector.broadcast %210 : vector<1x32xf32> to vector<16x32xf32>
    %212 = arith.addf %209, %211 : vector<16x32xf32>
    %213 = arith.addf %212, %198 : vector<16x32xf32>
    %214 = vector.extract_strided_slice %166 {offsets = [4, 0], sizes = [1, 32], strides = [1, 1]} : vector<8x32xf32> to vector<1x32xf32>
    %215 = vector.extract_strided_slice %166 {offsets = [5, 0], sizes = [1, 32], strides = [1, 1]} : vector<8x32xf32> to vector<1x32xf32>
    %cst_77 = arith.constant dense<0.000000e+00> : vector<16xf32>
    %216 = vector.multi_reduction <add>, %213, %cst_77 [1] : vector<16x32xf32> to vector<16xf32>
    %217 = vector.shape_cast %216 : vector<16xf32> to vector<16x1xf32>
    %cst_78 = arith.constant 3.200000e+01 : f32
    %218 = vector.broadcast %cst_78 : f32 to vector<16x1xf32>
    %219 = arith.divf %217, %218 : vector<16x1xf32>
    %220 = vector.broadcast %219 : vector<16x1xf32> to vector<16x32xf32>
    %221 = arith.subf %213, %220 : vector<16x32xf32>
    %222 = arith.mulf %221, %221 : vector<16x32xf32>
    %cst_79 = arith.constant dense<0.000000e+00> : vector<16xf32>
    %223 = vector.multi_reduction <add>, %222, %cst_79 [1] : vector<16x32xf32> to vector<16xf32>
    %224 = vector.shape_cast %223 : vector<16xf32> to vector<16x1xf32>
    %cst_80 = arith.constant 3.200000e+01 : f32
    %225 = vector.broadcast %cst_80 : f32 to vector<16x1xf32>
    %226 = arith.divf %224, %225 : vector<16x1xf32>
    %227 = vector.broadcast %219 : vector<16x1xf32> to vector<16x32xf32>
    %228 = arith.subf %213, %227 : vector<16x32xf32>
    %cst_81 = arith.constant 9.99999974E-6 : f32
    %229 = vector.broadcast %cst_81 : f32 to vector<16x1xf32>
    %230 = arith.addf %226, %229 : vector<16x1xf32>
    %231 = math.rsqrt %230 : vector<16x1xf32>
    %232 = vector.broadcast %231 : vector<16x1xf32> to vector<16x32xf32>
    %233 = arith.mulf %228, %232 : vector<16x32xf32>
    %234 = vector.broadcast %214 : vector<1x32xf32> to vector<16x32xf32>
    %235 = arith.mulf %233, %234 : vector<16x32xf32>
    %236 = vector.broadcast %215 : vector<1x32xf32> to vector<16x32xf32>
    %237 = arith.addf %235, %236 : vector<16x32xf32>
    %c0_82 = arith.constant 0 : index
    %c0_83 = arith.constant 0 : index
    %238 = vector.load %arg9[%c0_82, %c0_83] : memref<16x32xf32, #tpu.memory_space<vmem>>, vector<16x32xf32>
    tpu.vector_store %arg9[%c0_82, %c0_83], %237 {strides = array<i32>} : memref<16x32xf32, #tpu.memory_space<vmem>>, vector<16x32xf32>,
    return
  }
  func.func @transform_0(%arg0: i32) -> (i32, i32) {
    %c0_i32 = arith.constant 0 : i32
    %c0_i32_0 = arith.constant 0 : i32
    return %arg0, %c0_i32 : i32, i32
  }
  func.func @transform_1(%arg0: i32) -> (i32, i32) {
    %c0_i32 = arith.constant 0 : i32
    %c0_i32_0 = arith.constant 0 : i32
    return %arg0, %c0_i32 : i32, i32
  }
  func.func @transform_2(%arg0: i32) -> (i32, i32) {
    %c0_i32 = arith.constant 0 : i32
    %c0_i32_0 = arith.constant 0 : i32
    %c0_i32_1 = arith.constant 0 : i32
    return %c0_i32, %c0_i32_0 : i32, i32
  }
  func.func @transform_3(%arg0: i32) -> (i32, i32) {
    %c0_i32 = arith.constant 0 : i32
    %c0_i32_0 = arith.constant 0 : i32
    %c0_i32_1 = arith.constant 0 : i32
    return %c0_i32, %c0_i32_0 : i32, i32
  }
  func.func @transform_4(%arg0: i32) -> (i32, i32) {
    %c0_i32 = arith.constant 0 : i32
    %c0_i32_0 = arith.constant 0 : i32
    %c0_i32_1 = arith.constant 0 : i32
    return %c0_i32, %c0_i32_0 : i32, i32
  }
  func.func @transform_5(%arg0: i32) -> (i32, i32) {
    %c0_i32 = arith.constant 0 : i32
    %c0_i32_0 = arith.constant 0 : i32
    %c0_i32_1 = arith.constant 0 : i32
    return %c0_i32, %c0_i32_0 : i32, i32
  }
  func.func @transform_6(%arg0: i32) -> (i32, i32) {
    %c0_i32 = arith.constant 0 : i32
    %c0_i32_0 = arith.constant 0 : i32
    %c0_i32_1 = arith.constant 0 : i32
    return %c0_i32, %c0_i32_0 : i32, i32
  }
  func.func @transform_7(%arg0: i32) -> (i32, i32) {
    %c0_i32 = arith.constant 0 : i32
    %c0_i32_0 = arith.constant 0 : i32
    %c0_i32_1 = arith.constant 0 : i32
    return %c0_i32, %c0_i32_0 : i32, i32
  }
  func.func @transform_8(%arg0: i32) -> (i32, i32) {
    %c0_i32 = arith.constant 0 : i32
    %c0_i32_0 = arith.constant 0 : i32
    return %arg0, %c0_i32 : i32, i32
  }
}

</mosaic_0001>

<bundles_post_ra>
// kernel: tpu_custom_call.1
= control target key start
LH: loop header
LB: loop body
LE: loop exit
PB: predicated region body
PF: predicated region fallthrough
CT: control target
= control target key end

     0   :  { %vm76_vm0 = vcmask 261120   ;;  %s2278_s0 = inlined_call_operand.vmem [shape: f32[16,32], index: 0, kind: input, shape index: {}]   ;;  %s2279_s1 = inlined_call_operand.vmem [shape: f32[2,8], index: 1, kind: input, shape index: {}]   ;;  %s2280_s2 = inlined_call_operand.vmem [shape: bf16[96,32], index: 2, kind: input, shape index: {}]   ;;  %s2281_s3 = inlined_call_operand.vmem [shape: bf16[32,32], index: 3, kind: input, shape index: {}]   ;;  %s2282_s4 = inlined_call_operand.vmem [shape: f32[8,32], index: 4, kind: input, shape index: {}]   ;;  %s2283_s5 = inlined_call_operand.vmem [shape: bf16[32,128], index: 5, kind: input, shape index: {}]   ;;  %s2284_s6 = inlined_call_operand.vmem [shape: f32[1,128], index: 6, kind: input, shape index: {}]   ;;  %s2285_s7 = inlined_call_operand.vmem [shape: bf16[128,32], index: 7, kind: input, shape index: {}]   ;;  %s2286_s8 = inlined_call_operand.hbm [shape: f32[16,32], index: 8, kind: output, shape index: {}]  }
   0x1   :  { %v1974_v0 = vld [vmem:[%s2278_s0] sm:$0xff]  ;;  %v1979_v1 = vld [vmem:[%s2278_s0 + $0x8] sm:$0xff]  ;;  %v1840_v5 = vld [vmem:[%s2280_s2 + $0x10] sm:$0xff]  }
   0x2   :  { %v45_v2 = vpack.c.bf16 %v1979_v1, %v1974_v0  ;;  %v1838_v3 = vld [vmem:[%s2280_s2] sm:$0xff]   ;;  %v1839_v6 = vld [vmem:[%s2280_s2 + $0x8] sm:$0xff]   ;;  %1685 = vmatprep.mubr.msk.bf16.mxu1 %vm76_vm0, %v1840_v5  ;;  %v1841_v7 = vld [vmem:[%s2280_s2 + $0x18] sm:$0xff]  }
   0x3   :  { %1681 = vmatprep.mubr.msk.bf16.mxu0 %vm76_vm0, %v1838_v3 }
   0x4   :  { %1827 = vmatprep.subr.msk.bf16.mxu0 %vm76_vm0, %v45_v2  ;;  %v96_v4 = vsel %vm76_vm0, %v45_v2, 0  ;;  %1828 = vmatprep.subr.msk.bf16.mxu1 %vm76_vm0, %v45_v2 }
   0x5   :  { %1680 = vmatpush3.bf16.xpose.msra.mxu0 %v96_v4  ;;  %1826 = vmatpush3.bf16.xpose.msra.mxu1 %v96_v4 }
   0xc   :  { %1682 = vmatmul.mubr.msk.bf16.vlgmr.msra.gmra.mxu0 %vm76_vm0, %v1839_v6  ;;  %1686 = vmatmul.mubr.msk.bf16.vlgmr.msra.gmra.mxu1 %vm76_vm0, %v1841_v7 }
   0xd   :  { %13 = vsyncpa [#allocation4], 0  ;;  %v1842_v8 = vld [vmem:[%s2280_s2 + $0x20] sm:$0xff]   ;;  %v1843_v9 = vld [vmem:[%s2280_s2 + $0x28] sm:$0xff]   ;;  %v1918_v10 = vmov 0.0   ;;  %vm1919_vm1 = vmmov 0   ;;  %v188_v34 = vlaneseq }
   0xe   :  { %1693 = vmatprep.subr.bf16.mxu1 %v1918_v10  ;;  %1717 = vmatprep.subr.bf16.mxu0 %v1918_v10  ;;  %vm212_vm2 = vcmask 1043456   ;;  %s1920_s2 = smov 120   ;;  %vm208_vm3 = vcmask 64512   ;;  %v185_v35 = vld [vmem:[%s2279_s1] sm:$0x3]  ;;  %s1921_s1 = smov 8  }
   0xf   :  { %1689 = vmatprep.mubr.msk.bf16.mxu1 %vm76_vm0, %v1842_v8  ;;  %1719 = vmatprep.mubr.msk.bf16.mxu0 %vm1919_vm1, %v1918_v10  ;;  %v2041_v36 = vshrl.u32 %v188_v34, 7  ;;  %vm186_vm4 = vcmp.eq.f32.partialorder %v185_v35, 0.0  ;;  %s1922_s22 = smov 16   ;;  %s1923_s23 = smov 24   ;;  %vm446_vm5 = vcmask 130112   ;;  %vm572_vm6 = vcmask 195712  }
  0x10   :  { %v2045_v38 = vsel %vm186_vm4, -1.767767e+19, %v1918_v10  ;;  %vm705_vm7 = vcmask 261312  }
  0x11   :  { %v190_v37 = vsub.s32 0, %v2041_v36 }
  0x13   :  { %v2050_v39 = vrot.slane %v2045_v38, %v190_v37 }
  0x14   :  { %1690 = vmatmul.mubr.msk.bf16.gmra.mxu1 %vm76_vm0, %v1843_v9 }
  0x15   :  { %1695 = vmatprep.mubr.msk.bf16.mxu1 %vm1919_vm1, %v1918_v10 }
  0xcc   :  { %v1683_v11 = vpop.f32.mrf.mxu0  ;;  %v1687_v12 = vpop.f32.mrf.mxu1 }
  0xce   :  { %v132_v13 = vpop.f32.mrf.mxu0  ;;  %v148_v14 = vpop.f32.mrf.mxu1 }
  0xd0   :  { %v1684_v15 = vpop.f32.mrf.mxu0  ;;  %v1688_v16 = vpop.f32.mrf.mxu1 }
  0xd1   :  { %v2016_v18 = vpack.c.bf16 %v1688_v16, %v1687_v12  ;;  %v180_v25 = vpack.c.bf16 %v1684_v15, %v1683_v11 }
  0xd2   :  { %v135_v17 = vpop.f32.mrf.mxu0  ;;  %v151_v20 = vpop.f32.mrf.mxu1 }
  0xd3   :  { %v179_v19 = vpack.c.bf16 %v135_v17, %v132_v13  ;;  %v2018_v21 = vpack.c.bf16 %v151_v20, %v148_v14  ;;  %v468_v22 = vsel %vm212_vm2, %v2016_v18, 0  ;;  %v594_v47 = vrot.slane %v2016_v18, 4 }
  0xd4   :  { %1718 = vmatpush3.bf16.msra.mxu0 %v468_v22  ;;  %v1691_v26 = vpop.f32.mrf.mxu1  ;;  %v575_v58 = vrot.slane %v180_v25, 4 }
  0xd5   :  { %192 = vxpose.xlu0.c.b16.start.end [1/1] (short) (narrow) %v179_v19, 16  ;;  %v316_v23 = vrot.slane %v179_v19, 4  ;;  %v214_v24 = vsel %vm212_vm2, %v2018_v21, 0  ;;  %1729 = vmatprep.subr.bf16.mxu0 %v1918_v10  ;;  %v335_v46 = vrot.slane %v2018_v21, 4  ;;  %v599_v55 = vsel %vm212_vm2, %v594_v47, 0 }
  0xd6   :  { %1694 = vmatpush3.bf16.msra.mxu1 %v214_v24  ;;  %v164_v27 = vpop.f32.mrf.mxu1 }
  0xd7   :  { %318 = vxpose.xlu1.c.b16.start.end [1/1] (short) (narrow) %v316_v23, 16  ;;  %1699 = vmatprep.subr.bf16.mxu1 %v1918_v10  ;;  %v340_v6 = vsel %vm212_vm2, %v335_v46, 0 }
  0xd8   :  { %v1692_v28 = vpop.f32.mrf.mxu1 }
  0xd9   :  { %v2028_v29 = vpack.c.bf16 %v1692_v28, %v1691_v26 }
  0xda   :  { %v167_v30 = vpop.f32.mrf.mxu1 }
  0xdb   :  { %711 = vrot.lane.b32.xlu1 %v179_v19, %s1920_s2  ;;  %v2030_v31 = vpack.c.bf16 %v167_v30, %v164_v27 }
  0xdd   :  { %v272_v32 = vsel %vm208_vm3, %v2030_v31, 0  ;;  %v395_v9 = vrot.slane %v2030_v31, 4 }
  0xdf   :  { %971 = vrot.lane.b32.xlu1 %v180_v25, %s1920_s2  ;;  %v400_v12 = vsel %vm208_vm3, %v395_v9, 0 }
 0x137   :  { %v200_v33 = vpop.trf.xlu0 }
 0x138   :  { %1696 = vmatmul.mubr.msk.bf16.vlgmr.msra.gmra.mxu1 %vm208_vm3, %v200_v33 }
 0x139   :  { %1700 = vmatpush3.bf16.xpose.msra.mxu1 %v272_v32  ;;  %1701 = vmatprep.mubr.msk.bf16.mxu1 %vm1919_vm1, %v1918_v10  ;;  %v326_v48 = vpop.trf.xlu1  ;;  %v709_v32 = vsub.s32 1, %v2041_v36 }
 0x13a   :  { %1705 = vmatprep.subr.bf16.mxu1 %v1918_v10 }
 0x14d   :  { %v712_v49 = vpop.permute.xlu1 %711 }
 0x151   :  { %v972_v59 = vpop.permute.xlu1 %971 }
 0x1f8   :  { %v250_v40 = vpop.f32.mrf.mxu1 }
 0x1f9   :  { %v251_v41 = vadd.f32 %v250_v40, %v2050_v39 }
 0x1fa   :  { %v1697_v42 = vpop.f32.mrf.mxu1 }
 0x1fb   :  { %v256_v43 = vsel %vm208_vm3, %v251_v41, -inf }
 0x1fc   :  { %257 = vmax.xlane.f32.xlu0 %v256_v43  ;;  %v253_v44 = vpop.f32.mrf.mxu1 }
 0x1fe   :  { %v1698_v45 = vpop.f32.mrf.mxu1 }
 0x212   :  { %839 = vrot.lane.b32.xlu0 %v316_v23, %s1920_s2 }
 0x230   :  { %448 = vxpose.xlu0.c.b16.start.end [1/1] (short) (narrow) %v180_v25, 16 }
 0x239   :  { %858 = vrot.lane.b32.xlu0 %v335_v46, %s1920_s2 }
 0x23d   :  { %1122 = vrot.lane.b32.xlu0 %v594_v47, %s1920_s2 }
 0x25b   :  { %714 = vxpose.xlu0.c.b16.start.end [1/1] (short) (narrow) %v712_v49, 16 }
 0x285   :  { %v258_v50 = vpop.xlane.xlu0 %257 }
 0x286   :  { %v259_v51 = vsub.f32 %v251_v41, %v258_v50  ;;  %v710_v41 = vrot.slane %v2045_v38, %v709_v32 }
 0x288   :  { %v260_v52 = vmul.f32 1.442695, %v259_v51 }
 0x289   :  { %v840_v53 = vpop.permute.xlu0 %839 }
 0x28a   :  { %1856 = vpow2.f32 %v260_v52 }
 0x292   :  { %v456_v54 = vpop.trf.xlu0 }
 0x293   :  { %1720 = vmatmul.mubr.msk.bf16.vlgmr.msra.gmra.mxu0 %vm208_vm3, %v456_v54 }
 0x294   :  { %1730 = vmatpush3.bf16.msra.mxu0 %v599_v55  ;;  %1731 = vmatprep.mubr.msk.bf16.mxu0 %vm1919_vm1, %v1918_v10 }
 0x295   :  { %1741 = vmatprep.subr.bf16.mxu0 %v1918_v10 }
 0x297   :  { %v1857_v56 = vpop.eup %1856 }
 0x298   :  { %v262_v57 = vsel %vm208_vm3, %v1857_v56, 0.0 }
 0x299   :  { %263 = vadd.xlane.f32.xlu1 %v262_v57 }
 0x2aa   :  { %1103 = vrot.lane.b32.xlu1 %v575_v58, %s1920_s2 }
 0x2ab   :  { %v859_v3 = vpop.permute.xlu0 %858 }
 0x2ac   :  { %v864_v14 = vsel %vm212_vm2, %v859_v3, 0 }
 0x2ae   :  { %730 = vrot.lane.b32.xlu1 %v2018_v21, %s1920_s2 }
 0x2af   :  { %v1123_v11 = vpop.permute.xlu0 %1122 }
 0x2b2   :  { %990 = vrot.lane.b32.xlu1 %v2016_v18, %s1920_s2  ;;  %v1128_v18 = vsel %vm212_vm2, %v1123_v11, 0 }
 0x2bd   :  { %v722_v13 = vpop.trf.xlu0 }
 0x2d5   :  { %577 = vxpose.xlu1.c.b16.start.end [1/1] (short) (narrow) %v575_v58, 16 }
 0x2d9   :  { %842 = vxpose.xlu1.c.b16.start.end [1/1] (short) (narrow) %v840_v53, 16 }
 0x2dd   :  { %974 = vxpose.xlu1.c.b16.start.end [1/1] (short) (narrow) %v972_v59, 16 }
 0x322   :  { %v264_v60 = vpop.xlane.xlu1 %263 }
 0x323   :  { %1858 = vrcp.f32 %v264_v60 }
 0x326   :  { %v1104_v61 = vpop.permute.xlu1 %1103 }
 0x327   :  { %1106 = vxpose.xlu0.c.b16.start.end [1/1] (short) (narrow) %v1104_v61, 16 }
 0x32a   :  { %v731_v62 = vpop.permute.xlu1 %730 }
 0x32b   :  { %v736_v8 = vsel %vm212_vm2, %v731_v62, 0 }
 0x32e   :  { %v991_v4 = vpop.permute.xlu1 %990 }
 0x32f   :  { %v996_v16 = vsel %vm212_vm2, %v991_v4, 0 }
 0x330   :  { %v1859_v63 = vpop.eup %1858 }
 0x331   :  { %v266_v2 = vmul.f32 %v1859_v63, %v1857_v56 }
 0x333   :  { %v267_v5 = vpack.c.bf16 %v266_v2, %v266_v2 }
 0x335   :  { %1702 = vmatmul.mubr.msk.bf16.vlgmr.msra.gmra.mxu1 %vm208_vm3, %v267_v5 }
 0x336   :  { %1706 = vmatpush3.bf16.msra.mxu1 %v340_v6  ;;  %1707 = vmatprep.mubr.msk.bf16.mxu1 %vm1919_vm1, %v1918_v10 }
 0x337   :  { %v585_v7 = vpop.trf.xlu1  ;;  %1711 = vmatprep.subr.bf16.mxu1 %v1918_v10 }
 0x338   :  { %1732 = vmatmul.mubr.msk.bf16.vlgmr.msra.gmra.mxu0 %vm208_vm3, %v585_v7 }
 0x339   :  { %1742 = vmatpush3.bf16.msra.mxu0 %v736_v8  ;;  %1743 = vmatprep.mubr.msk.bf16.mxu0 %vm1919_vm1, %v1918_v10 }
 0x33a   :  { %1753 = vmatprep.subr.bf16.mxu0 %v1918_v10 }
 0x33b   :  { %v850_v15 = vpop.trf.xlu1 }
 0x33d   :  { %1708 = vmatmul.mubr.msk.bf16.vlgmr.msra.gmra.mxu1 %vm208_vm3, %v326_v48 }
 0x33e   :  { %1712 = vmatpush3.bf16.xpose.msra.mxu1 %v400_v12  ;;  %1713 = vmatprep.mubr.msk.bf16.mxu1 %vm1919_vm1, %v1918_v10 }
 0x33f   :  { %1723 = vmatprep.subr.bf16.mxu1 %v1918_v10  ;;  %v982_v17 = vpop.trf.xlu1 }
 0x340   :  { %1744 = vmatmul.mubr.msk.bf16.vlgmr.msra.gmra.mxu0 %vm208_vm3, %v722_v13 }
 0x341   :  { %1754 = vmatpush3.bf16.msra.mxu0 %v864_v14  ;;  %1755 = vmatprep.mubr.msk.bf16.mxu0 %vm1919_vm1, %v1918_v10 }
 0x342   :  { %1765 = vmatprep.subr.bf16.mxu0 %v1918_v10 }
 0x348   :  { %1756 = vmatmul.mubr.msk.bf16.vlgmr.msra.gmra.mxu0 %vm208_vm3, %v850_v15 }
 0x349   :  { %1766 = vmatpush3.bf16.msra.mxu0 %v996_v16  ;;  %1767 = vmatprep.mubr.msk.bf16.mxu0 %vm1919_vm1, %v1918_v10 }
 0x34a   :  { %1777 = vmatprep.subr.bf16.mxu0 %v1918_v10 }
 0x350   :  { %1768 = vmatmul.mubr.msk.bf16.vlgmr.msra.gmra.mxu0 %vm208_vm3, %v982_v17 }
 0x351   :  { %1778 = vmatpush3.bf16.msra.mxu0 %v1128_v18  ;;  %1779 = vmatprep.mubr.msk.bf16.mxu0 %vm1919_vm1, %v1918_v10 }
 0x352   :  { %1789 = vmatprep.subr.bf16.mxu0 %v1918_v10 }
 0x353   :  { %v504_v19 = vpop.f32.mrf.mxu0 }
 0x354   :  { %v505_v20 = vadd.f32 %v504_v19, %v2050_v39 }
 0x355   :  { %v1721_v21 = vpop.f32.mrf.mxu0 }
 0x356   :  { %v510_v22 = vsel %vm208_vm3, %v505_v20, -inf }
 0x357   :  { %511 = vmax.xlane.f32.xlu0 %v510_v22  ;;  %v507_v23 = vpop.f32.mrf.mxu0 }
 0x359   :  { %v1722_v24 = vpop.f32.mrf.mxu0 }
 0x389   :  { %v1114_v25 = vpop.trf.xlu0 }
 0x38a   :  { %1780 = vmatmul.mubr.msk.bf16.vlgmr.msra.gmra.mxu0 %vm208_vm3, %v1114_v25 }
 0x38b   :  { %1793 = vmatprep.mubr.msk.bf16.mxu0 %vm1919_vm1, %v1918_v10 }
 0x3e0   :  { %v512_v4 = vpop.xlane.xlu0 %511 }
 0x3e1   :  { %v513_v5 = vsub.f32 %v505_v20, %v512_v4 }
 0x3e3   :  { %v514_v6 = vmul.f32 1.442695, %v513_v5 }
 0x3e5   :  { %1860 = vpow2.f32 %v514_v6 }
 0x3f2   :  { %v2121_v13 = vpop.eup %1860 }
 0x3f3   :  { %v516_v16 = vsel %vm208_vm3, %v2121_v13, 0.0 }
 0x3f5   :  { %v308_v26 = vpop.f32.mrf.mxu1 }
 0x3f6   :  { %314 = vst.msk [vmem:[#allocation2] sm:$0xff] %vm208_vm3, %v308_v26 }
 0x3f7   :  { %v1703_v27 = vpop.f32.mrf.mxu1 }
 0x3f8   :  { %v635_v28 = vpop.f32.mrf.mxu0 }
 0x3f9   :  { %v311_v30 = vpop.f32.mrf.mxu1  ;;  %v636_v42 = vadd.f32 %v635_v28, %v2050_v39 }
 0x3fa   :  { %v1733_v33 = vpop.f32.mrf.mxu0 }
 0x3fb   :  { %v1704_v34 = vpop.f32.mrf.mxu1  ;;  %v641_v51 = vsel %vm208_vm3, %v636_v42, -inf }
 0x3fc   :  { %v638_v35 = vpop.f32.mrf.mxu0 }
 0x3fd   :  { %v376_v40 = vpop.f32.mrf.mxu1 }
 0x3fe   :  { %v377_v43 = vadd.f32 %v376_v40, %v2050_v39  ;;  %v1734_v44 = vpop.f32.mrf.mxu0 }
 0x3ff   :  { %v1709_v45 = vpop.f32.mrf.mxu1 }
 0x400   :  { %v772_v46 = vpop.f32.mrf.mxu0  ;;  %v382_v47 = vsel %vm208_vm3, %v377_v43, -inf }
 0x401   :  { %v773_v48 = vadd.f32 %v772_v46, %v710_v41  ;;  %v379_v49 = vpop.f32.mrf.mxu1  ;;  %383 = vmax.xlane.f32.xlu1 %v382_v47 }
 0x402   :  { %v1745_v50 = vpop.f32.mrf.mxu0 }
 0x403   :  { %v1710_v52 = vpop.f32.mrf.mxu1  ;;  %v778_v53 = vsel %vm208_vm3, %v773_v48, -inf }
 0x404   :  { %779 = vmax.xlane.f32.xlu0 %v778_v53  ;;  %v775_v38 = vpop.f32.mrf.mxu0 }
 0x405   :  { %642 = vmax.xlane.f32.xlu1 %v641_v51  ;;  %v654_v38 = vrot.slane %v2028_v29, 4 }
 0x406   :  { %v1746_v54 = vpop.f32.mrf.mxu0 }
 0x408   :  { %v900_v55 = vpop.f32.mrf.mxu0 }
 0x409   :  { %v901_v39 = vadd.f32 %v900_v55, %v710_v41 }
 0x40a   :  { %v1757_v56 = vpop.f32.mrf.mxu0 }
 0x40b   :  { %v906_v57 = vsel %vm208_vm3, %v901_v39, -inf }
 0x40c   :  { %907 = vmax.xlane.f32.xlu1 %v906_v57  ;;  %v903_v58 = vpop.f32.mrf.mxu0 }
 0x40e   :  { %v1758_v59 = vpop.f32.mrf.mxu0 }
 0x410   :  { %v1032_v60 = vpop.f32.mrf.mxu0 }
 0x411   :  { %v1033_v61 = vadd.f32 %v1032_v60, %v710_v41 }
 0x412   :  { %v1769_v62 = vpop.f32.mrf.mxu0 }
 0x413   :  { %v1038_v63 = vsel %vm208_vm3, %v1033_v61, -inf }
 0x414   :  { %1039 = vmax.xlane.f32.xlu0 %v1038_v63  ;;  %v1035_v2 = vpop.f32.mrf.mxu0 }
 0x415   :  { %v659_v2 = vsel %vm208_vm3, %v654_v38, 0 }
 0x416   :  { %v1770_v3 = vpop.f32.mrf.mxu0 }
 0x44a   :  { %v1164_v7 = vpop.f32.mrf.mxu0 }
 0x44b   :  { %v1165_v8 = vadd.f32 %v1164_v7, %v710_v41 }
 0x44c   :  { %v1781_v11 = vpop.f32.mrf.mxu0 }
 0x44d   :  { %v1170_v12 = vsel %vm208_vm3, %v1165_v8, -inf }
 0x44e   :  { %1171 = vmax.xlane.f32.xlu1 %v1170_v12  ;;  %v1167_v14 = vpop.f32.mrf.mxu0 }
 0x450   :  { %v1782_v15 = vpop.f32.mrf.mxu0 }
 0x452   :  { %517 = vadd.xlane.f32.xlu1 %v516_v16 }
 0x48a   :  { %v384_v17 = vpop.xlane.xlu1 %383 }
 0x48b   :  { %v385_v18 = vsub.f32 %v377_v43, %v384_v17 }
 0x48d   :  { %v386_v19 = vmul.f32 1.442695, %v385_v18  ;;  %v780_v20 = vpop.xlane.xlu0 %779 }
 0x48e   :  { %v781_v21 = vsub.f32 %v773_v48, %v780_v20  ;;  %v643_v22 = vpop.xlane.xlu1 %642 }
 0x48f   :  { %1862 = vpow2.f32 %v386_v19  ;;  %v644_v23 = vsub.f32 %v636_v42, %v643_v22 }
 0x490   :  { %v782_v24 = vmul.f32 1.442695, %v781_v21 }
 0x491   :  { %v645_v25 = vmul.f32 1.442695, %v644_v23 }
 0x492   :  { %1864 = vpow2.f32 %v782_v24 }
 0x493   :  { %1866 = vpow2.f32 %v645_v25 }
 0x495   :  { %v908_v26 = vpop.xlane.xlu1 %907 }
 0x496   :  { %v909_v27 = vsub.f32 %v901_v39, %v908_v26 }
 0x498   :  { %v910_v28 = vmul.f32 1.442695, %v909_v27 }
 0x49a   :  { %1868 = vpow2.f32 %v910_v28 }
 0x49c   :  { %v1863_v30 = vpop.eup %1862 }
 0x49d   :  { %v1040_v33 = vpop.xlane.xlu0 %1039  ;;  %v388_v34 = vsel %vm208_vm3, %v1863_v30, 0.0 }
 0x49e   :  { %v1041_v35 = vsub.f32 %v1033_v61, %v1040_v33  ;;  %389 = vadd.xlane.f32.xlu0 %v388_v34 }
 0x49f   :  { %v1865_v40 = vpop.eup %1864 }
 0x4a0   :  { %v1867_v41 = vpop.eup %1866  ;;  %v1042_v43 = vmul.f32 1.442695, %v1041_v35  ;;  %v784_v44 = vsel %vm208_vm3, %v1865_v40, 0.0 }
 0x4a1   :  { %785 = vadd.xlane.f32.xlu1 %v784_v44  ;;  %v647_v42 = vsel %vm208_vm3, %v1867_v41, 0.0 }
 0x4a2   :  { %1870 = vpow2.f32 %v1042_v43  ;;  %648 = vadd.xlane.f32.xlu0 %v647_v42 }
 0x4a7   :  { %v2128_v45 = vpop.eup %1868 }
 0x4a8   :  { %v912_v46 = vsel %vm208_vm3, %v2128_v45, 0.0 }
 0x4a9   :  { %913 = vadd.xlane.f32.xlu0 %v912_v46 }
 0x4af   :  { %v2132_v47 = vpop.eup %1870 }
 0x4b0   :  { %v1044_v48 = vsel %vm208_vm3, %v2132_v47, 0.0 }
 0x4b1   :  { %1045 = vadd.xlane.f32.xlu1 %v1044_v48 }
 0x4bf   :  { %790 = vrot.lane.b32.xlu0 %v2030_v31, %s1920_s2  ;;  %v526_v31 = vsel %vm208_vm3, %v2028_v29, 0 }
 0x4c3   :  { %1050 = vrot.lane.b32.xlu0 %v2028_v29, %s1920_s2 }
 0x4d7   :  { %v1172_v49 = vpop.xlane.xlu1 %1171 }
 0x4d8   :  { %v1173_v50 = vsub.f32 %v1165_v8, %v1172_v49 }
 0x4da   :  { %v1174_v51 = vmul.f32 1.442695, %v1173_v50 }
 0x4db   :  { %v518_v55 = vpop.xlane.xlu1 %517 }
 0x4dc   :  { %1872 = vpow2.f32 %v1174_v51 }
 0x4e9   :  { %v2140_v52 = vpop.eup %1872 }
 0x4ea   :  { %v1176_v53 = vsel %vm208_vm3, %v2140_v52, 0.0 }
 0x4eb   :  { %1177 = vadd.xlane.f32.xlu1 %v1176_v53 }
 0x4fc   :  { %918 = vrot.lane.b32.xlu1 %v395_v9, %s1920_s2 }
 0x500   :  { %1182 = vrot.lane.b32.xlu1 %v654_v38, %s1920_s2  ;;  %v1844_v38 = vld [vmem:[%s2281_s3 + $0x8] sm:$0xff]  }
 0x501   :  { %1790 = vmatpush3.bf16.msra.mxu0 %v1844_v38 }
 0x502   :  { %1791 = vmatprep.subr.bf16.mxu0 %v1918_v10 }
 0x527   :  { %v390_v54 = vpop.xlane.xlu0 %389 }
 0x528   :  { %1874 = vrcp.f32 %v390_v54 }
 0x529   :  { %1876 = vrcp.f32 %v518_v55  ;;  %v1845_v55 = vld [vmem:[%s2281_s3] sm:$0xff]  }
 0x52a   :  { %v786_v60 = vpop.xlane.xlu1 %785  ;;  %1792 = vmatpush3.bf16.msra.mxu0 %v1845_v55 }
 0x52b   :  { %v649_v39 = vpop.xlane.xlu0 %648  ;;  %1805 = vmatprep.subr.bf16.mxu0 %v1918_v10 }
 0x52c   :  { %1878 = vrcp.f32 %v649_v39 }
 0x52d   :  { %1880 = vrcp.f32 %v786_v60 }
 0x532   :  { %v914_v63 = vpop.xlane.xlu0 %913 }
 0x533   :  { %1882 = vrcp.f32 %v914_v63 }
 0x535   :  { %v1875_v56 = vpop.eup %1874 }
 0x536   :  { %v392_v57 = vmul.f32 %v1875_v56, %v1863_v30  ;;  %v1877_v59 = vpop.eup %1876  ;;  %v791_v3 = vpop.permute.xlu0 %790 }
 0x537   :  { %v520_v9 = vmul.f32 %v1877_v59, %v2121_v13  ;;  %v796_v6 = vsel %vm208_vm3, %v791_v3, 0 }
 0x538   :  { %v393_v58 = vpack.c.bf16 %v392_v57, %v392_v57 }
 0x539   :  { %v521_v61 = vpack.c.bf16 %v520_v9, %v520_v9  ;;  %v1879_v62 = vpop.eup %1878 }
 0x53a   :  { %1714 = vmatmul.mubr.msk.bf16.vlgmr.msra.gmra.mxu1 %vm208_vm3, %v393_v58  ;;  %v651_v29 = vmul.f32 %v1879_v62, %v1867_v41  ;;  %v1881_v5 = vpop.eup %1880  ;;  %v1046_v11 = vpop.xlane.xlu1 %1045 }
 0x53b   :  { %1724 = vmatpush3.bf16.xpose.msra.mxu1 %v526_v31  ;;  %1725 = vmatprep.mubr.msk.bf16.mxu1 %vm1919_vm1, %v1918_v10  ;;  %v788_v7 = vmul.f32 %v1881_v5, %v1865_v40  ;;  %1884 = vrcp.f32 %v1046_v11  ;;  %v1051_v17 = vpop.permute.xlu0 %1050 }
 0x53c   :  { %1735 = vmatprep.subr.bf16.mxu1 %v1918_v10  ;;  %v652_v4 = vpack.c.bf16 %v651_v29, %v651_v29  ;;  %v1056_v20 = vsel %vm208_vm3, %v1051_v17, 0 }
 0x53d   :  { %v789_v8 = vpack.c.bf16 %v788_v7, %v788_v7  ;;  %v2204_v7 = vld [vmem:[%s2282_s4] sm:$0xff] }
 0x540   :  { %v1883_v13 = vpop.eup %1882 }
 0x541   :  { %v916_v16 = vmul.f32 %v1883_v13, %v2128_v45 }
 0x542   :  { %1726 = vmatmul.mubr.msk.bf16.vlgmr.msra.gmra.mxu1 %vm208_vm3, %v521_v61 }
 0x543   :  { %1736 = vmatpush3.bf16.xpose.msra.mxu1 %v659_v2  ;;  %1737 = vmatprep.mubr.msk.bf16.mxu1 %vm1919_vm1, %v1918_v10  ;;  %v917_v18 = vpack.c.bf16 %v916_v16, %v916_v16 }
 0x544   :  { %1747 = vmatprep.subr.bf16.mxu1 %v1918_v10 }
 0x548   :  { %v1885_v19 = vpop.eup %1884 }
 0x549   :  { %v1048_v21 = vmul.f32 %v1885_v19, %v2132_v47 }
 0x54a   :  { %1738 = vmatmul.mubr.msk.bf16.vlgmr.msra.gmra.mxu1 %vm208_vm3, %v652_v4 }
 0x54b   :  { %1748 = vmatpush3.bf16.xpose.msra.mxu1 %v796_v6  ;;  %1749 = vmatprep.mubr.msk.bf16.mxu1 %vm1919_vm1, %v1918_v10  ;;  %v1049_v23 = vpack.c.bf16 %v1048_v21, %v1048_v21 }
 0x54c   :  { %1759 = vmatprep.subr.bf16.mxu1 %v1918_v10 }
 0x552   :  { %1750 = vmatmul.mubr.msk.bf16.vlgmr.msra.gmra.mxu1 %vm208_vm3, %v789_v8  ;;  %v1246_v8 = vrot.slane %v2204_v7, %v190_v37 }
 0x553   :  { %1761 = vmatprep.mubr.msk.bf16.mxu1 %vm1919_vm1, %v1918_v10 }
 0x574   :  { %v1178_v12 = vpop.xlane.xlu1 %1177 }
 0x575   :  { %1886 = vrcp.f32 %v1178_v12 }
 0x578   :  { %v919_v14 = vpop.permute.xlu1 %918 }
 0x579   :  { %v924_v15 = vsel %vm208_vm3, %v919_v14, 0 }
 0x57a   :  { %1760 = vmatpush3.bf16.xpose.msra.mxu1 %v924_v15 }
 0x57b   :  { %1771 = vmatprep.subr.bf16.mxu1 %v1918_v10 }
 0x57c   :  { %v1183_v22 = vpop.permute.xlu1 %1182 }
 0x57d   :  { %v1188_v25 = vsel %vm208_vm3, %v1183_v22, 0 }
 0x581   :  { %1762 = vmatmul.mubr.msk.bf16.vlgmr.msra.gmra.mxu1 %vm208_vm3, %v917_v18 }
 0x582   :  { %1772 = vmatpush3.bf16.xpose.msra.mxu1 %v1056_v20  ;;  %1773 = vmatprep.mubr.msk.bf16.mxu1 %vm1919_vm1, %v1918_v10  ;;  %v1887_v24 = vpop.eup %1886 }
 0x583   :  { %1783 = vmatprep.subr.bf16.mxu1 %v1918_v10  ;;  %v1180_v26 = vmul.f32 %v1887_v24, %v2140_v52 }
 0x585   :  { %v1181_v27 = vpack.c.bf16 %v1180_v26, %v1180_v26 }
 0x589   :  { %1774 = vmatmul.mubr.msk.bf16.vlgmr.msra.gmra.mxu1 %vm208_vm3, %v1049_v23 }
 0x58a   :  { %1784 = vmatpush3.bf16.xpose.msra.mxu1 %v1188_v25  ;;  %1785 = vmatprep.mubr.msk.bf16.mxu1 %vm1919_vm1, %v1918_v10 }
 0x58b   :  { %1797 = vmatprep.subr.bf16.mxu1 %v1918_v10 }
 0x591   :  { %1786 = vmatmul.mubr.msk.bf16.vlgmr.msra.gmra.mxu1 %vm208_vm3, %v1181_v27 }
 0x592   :  { %1801 = vmatprep.mubr.msk.bf16.mxu1 %vm1919_vm1, %v1918_v10 }
 0x5fa   :  { %v436_v28 = vpop.f32.mrf.mxu1 }
 0x5fb   :  { %443 = vrot.lane.b32.xlu0 %v436_v28, %s1921_s1 }
 0x5fc   :  { %v1715_v30 = vpop.f32.mrf.mxu1 }
 0x5fd   :  { %v1847_v30 = vld [vmem:[%s2283_s5] sm:$0xff]  }
 0x5fe   :  { %v439_v33 = vpop.f32.mrf.mxu1 }
 0x5ff   :  { %v1848_v33 = vld [vmem:[%s2285_s7 + $0x38] sm:$0xff]  }
 0x600   :  { %v1716_v34 = vpop.f32.mrf.mxu1 }
 0x601   :  { %v1849_v34 = vld [vmem:[%s2285_s7 + $0x30] sm:$0xff]  }
 0x602   :  { %v562_v35 = vpop.f32.mrf.mxu1 }
 0x603   :  { %569 = vrot.lane.b32.xlu0 %v562_v35, %s1922_s22  ;;  %v1850_v35 = vld [vmem:[%s2285_s7 + $0x28] sm:$0xff]  }
 0x604   :  { %v1727_v40 = vpop.f32.mrf.mxu1 }
 0x605   :  { %v1851_v40 = vld [vmem:[%s2285_s7 + $0x20] sm:$0xff]  }
 0x606   :  { %v565_v41 = vpop.f32.mrf.mxu1 }
 0x607   :  { %v1852_v41 = vld [vmem:[%s2285_s7 + $0x18] sm:$0xff]  }
 0x608   :  { %v1728_v43 = vpop.f32.mrf.mxu1 }
 0x60a   :  { %v695_v44 = vpop.f32.mrf.mxu1 }
 0x60b   :  { %702 = vrot.lane.b32.xlu0 %v695_v44, %s1923_s23 }
 0x60c   :  { %v1739_v42 = vpop.f32.mrf.mxu1 }
 0x60e   :  { %v698_v45 = vpop.f32.mrf.mxu1 }
 0x610   :  { %v1740_v46 = vpop.f32.mrf.mxu1 }
 0x612   :  { %v832_v47 = vpop.f32.mrf.mxu1 }
 0x613   :  { %838 = vst.msk [vmem:[#allocation2 + $0x8] sm:$0xff] %vm208_vm3, %v832_v47 }
 0x614   :  { %v1751_v48 = vpop.f32.mrf.mxu1 }
 0x616   :  { %v835_v49 = vpop.f32.mrf.mxu1 }
 0x618   :  { %v1752_v50 = vpop.f32.mrf.mxu1 }
 0x619   :  { %v1335_v50 = vrot.slane %v2204_v7, %v709_v32  ;;  %v1854_v32 = vld [vmem:[%s2285_s7 + $0x8] sm:$0xff]  }
 0x641   :  { %v960_v51 = vpop.f32.mrf.mxu1 }
 0x642   :  { %967 = vrot.lane.b32.xlu1 %v960_v51, %s1921_s1  ;;  %v1340_v51 = vsub.s32 2, %v2041_v36 }
 0x643   :  { %v1763_v52 = vpop.f32.mrf.mxu1 }
 0x645   :  { %v963_v53 = vpop.f32.mrf.mxu1 }
 0x647   :  { %v1764_v54 = vpop.f32.mrf.mxu1 }
 0x648   :  { %v1341_v54 = vrot.slane %v2204_v7, %v1340_v51 }
 0x649   :  { %v1092_v39 = vpop.f32.mrf.mxu1 }
 0x64a   :  { %1099 = vrot.lane.b32.xlu1 %v1092_v39, %s1922_s22 }
 0x64b   :  { %v1775_v56 = vpop.f32.mrf.mxu1 }
 0x64d   :  { %v1095_v57 = vpop.f32.mrf.mxu1 }
 0x64f   :  { %v1776_v58 = vpop.f32.mrf.mxu1 }
 0x650   :  { %v1853_v58 = vld [vmem:[%s2285_s7 + $0x10] sm:$0xff]  }
 0x651   :  { %v1224_v59 = vpop.f32.mrf.mxu1 }
 0x652   :  { %1231 = vrot.lane.b32.xlu1 %v1224_v59, %s1923_s23  ;;  %v1855_v59 = vld [vmem:[%s2285_s7] sm:$0xff]  }
 0x653   :  { %v1787_v60 = vpop.f32.mrf.mxu1 }
 0x654   :  { %v1613_v60 = vld [vmem:[%s2284_s6] ss:$0 sm:$0xff]  ;;  %s1924_s6 = smov [#allocation3]  }
 0x655   :  { %v1227_v31 = vpop.f32.mrf.mxu1  ;;  %s1571_s7 = sshll.u32 %s1924_s6, 4  ;;  %s1572_s7 = int_to_ptr.vmem [resolvable:$true] %s1571_s7 }
 0x656   :  { %s1896_s25 = scalar_lea.vmem %s1572_s7, 256  ;;  %p1901_p1 = scmp.lt.s32.totalorder %s1572_s7, %s1572_s7 }
 0x657   :  { %v1788_v9 = vpop.f32.mrf.mxu1  ;;  %p1897_p0 = scmp.ne.s32.totalorder %s1572_s7, %s1896_s25  ;;  %p1902_p2 = scmp.lt.s32.totalorder %s1896_s25, %s1896_s25 }
 0x659   :  { %p1903_p3 = por %p1902_p2, %p1901_p1 }
 0x65b   :  { %p1904_p4 = pnand %p1903_p3, %p1897_p0 }
 0x66d   :  { %v444_v61 = vpop.permute.xlu0 %443 }
 0x66e   :  { %447 = vst.msk [vmem:[#allocation2] sm:$0xff] %vm446_vm5, %v444_v61 }
 0x675   :  { %v570_v62 = vpop.permute.xlu0 %569 }
 0x676   :  { %573 = vst.msk [vmem:[#allocation2] sm:$0xff] %vm572_vm6, %v570_v62 }
 0x67d   :  { %v703_v63 = vpop.permute.xlu0 %702 }
 0x67e   :  { %706 = vst.msk [vmem:[#allocation2] sm:$0xff] %vm705_vm7, %v703_v63 }
 0x685   :  { %v1236_v4 = vld [vmem:[#allocation2] sm:$0xff] }
 0x6b4   :  { %v968_v2 = vpop.permute.xlu1 %967 }
 0x6b5   :  { %970 = vst.msk [vmem:[#allocation2 + $0x8] sm:$0xff] %vm446_vm5, %v968_v2 }
 0x6bc   :  { %v1100_v29 = vpop.permute.xlu1 %1099 }
 0x6bd   :  { %1102 = vst.msk [vmem:[#allocation2 + $0x8] sm:$0xff] %vm572_vm6, %v1100_v29 }
 0x6c4   :  { %v1232_v3 = vpop.permute.xlu1 %1231 }
 0x6c5   :  { %1234 = vst.msk [vmem:[#allocation2 + $0x8] sm:$0xff] %vm705_vm7, %v1232_v3 }
 0x6cc   :  { %v1237_v5 = vld [vmem:[#allocation2 + $0x8] sm:$0xff] }
 0x6cd   :  { %v1238_v6 = vpack.c.bf16 %v1237_v5, %v1236_v4 }
 0x6cf   :  { %1794 = vmatmul.mubr.msk.bf16.vlgmr.msra.gmra.mxu0 %vm76_vm0, %v1238_v6 }
 0x6d0   :  { %1821 = vmatprep.mubr.msk.bf16.mxu0 %vm1919_vm1, %v1918_v10  ;;  %1806 = vmatpush3.bf16.msra.mxu0 %v1848_v33 }
 0x6d1   :  { %1807 = vmatprep.subr.bf16.mxu0 %v1918_v10 }
 0x6d4   :  { %1808 = vmatpush3.bf16.msra.mxu0 %v1849_v34 }
 0x6d5   :  { %1809 = vmatprep.subr.bf16.mxu0 %v1918_v10 }
 0x6d8   :  { %1810 = vmatpush3.bf16.msra.mxu0 %v1850_v35  ;;  %v1554_v35 = vsub.s32 4, %v2041_v36 }
 0x6d9   :  { %1811 = vmatprep.subr.bf16.mxu0 %v1918_v10 }
 0x6dc   :  { %1812 = vmatpush3.bf16.msra.mxu0 %v1851_v40  ;;  %v1560_v40 = vsub.s32 5, %v2041_v36 }
 0x6dd   :  { %1813 = vmatprep.subr.bf16.mxu0 %v1918_v10 }
 0x6e0   :  { %1814 = vmatpush3.bf16.msra.mxu0 %v1852_v41  ;;  %v1555_v41 = vrot.slane %v2204_v7, %v1554_v35 }
 0x6e1   :  { %1815 = vmatprep.subr.bf16.mxu0 %v1918_v10 }
 0x6e4   :  { %1816 = vmatpush3.bf16.msra.mxu0 %v1853_v58 }
 0x6e5   :  { %1817 = vmatprep.subr.bf16.mxu0 %v1918_v10 }
 0x6e8   :  { %1818 = vmatpush3.bf16.msra.mxu0 %v1854_v32 }
 0x6e9   :  { %1819 = vmatprep.subr.bf16.mxu0 %v1918_v10 }
 0x6ec   :  { %1820 = vmatpush3.bf16.msra.mxu0 %v1855_v59 }
 0x78f   :  { %v1296_v11 = vpop.f32.mrf.mxu0 }
 0x790   :  { %v1297_v12 = vadd.f32 %v1296_v11, %v1246_v8 }
 0x791   :  { %v1795_v13 = vpop.f32.mrf.mxu0 }
 0x792   :  { %v1303_v14 = vadd.f32 %v1297_v12, %v1974_v0 }
 0x793   :  { %v1299_v15 = vpop.f32.mrf.mxu0 }
 0x794   :  { %v1300_v16 = vadd.f32 %v1299_v15, %v1246_v8  ;;  %v1305_v17 = vsel %vm76_vm0, %v1303_v14, 0.0 }
 0x795   :  { %1306 = vadd.xlane.f32.xlu0 %v1305_v17  ;;  %v1796_v18 = vpop.f32.mrf.mxu0 }
 0x796   :  { %v1304_v19 = vadd.f32 %v1300_v16, %v1979_v1  ;;  %v1846_v1 = vld [vmem:[%s2283_s5 + $0x8] sm:$0xff]  }
 0x797   :  { %1798 = vmatpush3.bf16.msra.mxu1 %v1846_v1 }
 0x798   :  { %v1308_v20 = vsel %vm76_vm0, %v1304_v19, 0.0  ;;  %1799 = vmatprep.subr.bf16.mxu1 %v1918_v10  ;;  %v1433_v10 = vsub.s32 3, %v2041_v36 }
 0x799   :  { %1309 = vadd.xlane.f32.xlu1 %v1308_v20 }
 0x79a   :  { %v1434_v5 = vrot.slane %v2204_v7, %v1433_v10 }
 0x79b   :  { %1800 = vmatpush3.bf16.msra.mxu1 %v1847_v30 }
 0x81e   :  { %v1307_v21 = vpop.xlane.xlu0 %1306 }
 0x81f   :  { %v1312_v22 = vmul.f32 0.03125, %v1307_v21 }
 0x821   :  { %v1314_v23 = vsub.f32 %v1303_v14, %v1312_v22 }
 0x822   :  { %v1310_v37 = vpop.xlane.xlu1 %1309 }
 0x823   :  { %v1313_v24 = vmul.f32 0.03125, %v1310_v37  ;;  %v1316_v25 = vmul.f32 %v1314_v23, %v1314_v23 }
 0x825   :  { %v1315_v26 = vsub.f32 %v1304_v19, %v1313_v24  ;;  %v1318_v0 = vsel %vm76_vm0, %v1316_v25, 0.0 }
 0x826   :  { %1319 = vadd.xlane.f32.xlu0 %v1318_v0 }
 0x827   :  { %v1317_v27 = vmul.f32 %v1315_v26, %v1315_v26 }
 0x829   :  { %v1321_v28 = vsel %vm76_vm0, %v1317_v27, 0.0 }
 0x82a   :  { %1322 = vadd.xlane.f32.xlu0 %v1321_v28 }
 0x8af   :  { %v1320_v43 = vpop.xlane.xlu0 %1319 }
 0x8b0   :  { %v1324_v44 = vmul.f32 0.03125, %v1320_v43 }
 0x8b2   :  { %v1326_v42 = vadd.f32 1e-05, %v1324_v44 }
 0x8b3   :  { %v1323_v45 = vpop.xlane.xlu0 %1322 }
 0x8b4   :  { %1888 = vrsqrt.f32 %v1326_v42  ;;  %v1325_v46 = vmul.f32 0.03125, %v1323_v45  ;;  %v1561_v42 = vrot.slane %v2204_v7, %v1560_v40 }
 0x8b6   :  { %v1327_v47 = vadd.f32 1e-05, %v1325_v46 }
 0x8b8   :  { %1890 = vrsqrt.f32 %v1327_v47 }
 0x8c1   :  { %v1889_v48 = vpop.eup %1888 }
 0x8c2   :  { %v1330_v49 = vmul.f32 %v1889_v48, %v1314_v23 }
 0x8c4   :  { %v1336_v38 = vmul.f32 %v1335_v50, %v1330_v49 }
 0x8c5   :  { %v1891_v52 = vpop.eup %1890 }
 0x8c6   :  { %v1331_v53 = vmul.f32 %v1891_v52, %v1315_v26  ;;  %v1342_v39 = vadd.f32 %v1341_v54, %v1336_v38 }
 0x8c8   :  { %v1337_v55 = vmul.f32 %v1335_v50, %v1331_v53 }
 0x8ca   :  { %v1343_v56 = vadd.f32 %v1341_v54, %v1337_v55 }
 0x8cc   :  { %v1344_v57 = vpack.c.bf16 %v1343_v56, %v1342_v39 }
 0x8ce   :  { %1802 = vmatmul.mubr.msk.bf16.vlgmr.msra.gmra.mxu1 %vm76_vm0, %v1344_v57 }
 0x98e   :  { %v1405_v31 = vpop.f32.mrf.mxu1 }
 0x98f   :  { %v1406_v61 = vadd.f32 %v1613_v60, %v1405_v31 }
 0x990   :  { %v1803_v9 = vpop.f32.mrf.mxu1 }
 0x991   :  { %v1412_v29 = vmax.f32 %v1406_v61, 0.0 }
 0x992   :  { %v1408_v62 = vpop.f32.mrf.mxu1 }
 0x993   :  { %v1409_v63 = vadd.f32 %v1613_v60, %v1408_v62 }
 0x994   :  { %v1804_v2 = vpop.f32.mrf.mxu1 }
 0x995   :  { %v1413_v3 = vmax.f32 %v1409_v63, 0.0 }
 0x997   :  { %v1414_v4 = vpack.c.bf16 %v1413_v3, %v1412_v29 }
 0x999   :  { %1822 = vmatmul.mubr.bf16.vlgmr.msra.gmra.mxu0 %v1414_v4 }
 0xa59   :  { %v1517_v6 = vpop.f32.mrf.mxu0 }
 0xa5a   :  { %v1518_v8 = vadd.f32 %v1517_v6, %v1434_v5 }
 0xa5b   :  { %v1823_v11 = vpop.f32.mrf.mxu0 }
 0xa5c   :  { %v1524_v12 = vadd.f32 %v1518_v8, %v1342_v39 }
 0xa5d   :  { %v1520_v13 = vpop.f32.mrf.mxu0 }
 0xa5e   :  { %v1521_v14 = vadd.f32 %v1520_v13, %v1434_v5  ;;  %v1526_v15 = vsel %vm76_vm0, %v1524_v12, 0.0 }
 0xa5f   :  { %1527 = vadd.xlane.f32.xlu1 %v1526_v15  ;;  %v1824_v16 = vpop.f32.mrf.mxu0 }
 0xa60   :  { %v1525_v17 = vadd.f32 %v1521_v14, %v1343_v56 }
 0xa62   :  { %v1529_v18 = vsel %vm76_vm0, %v1525_v17, 0.0 }
 0xa63   :  { %1530 = vadd.xlane.f32.xlu0 %v1529_v18 }
 0xae8   :  { %v1528_v19 = vpop.xlane.xlu1 %1527 }
 0xae9   :  { %v1532_v20 = vmul.f32 0.03125, %v1528_v19 }
 0xaeb   :  { %v1534_v21 = vsub.f32 %v1524_v12, %v1532_v20 }
 0xaec   :  { %v1531_v22 = vpop.xlane.xlu0 %1530 }
 0xaed   :  { %v1533_v23 = vmul.f32 0.03125, %v1531_v22  ;;  %v1536_v37 = vmul.f32 %v1534_v21, %v1534_v21 }
 0xaef   :  { %v1535_v24 = vsub.f32 %v1525_v17, %v1533_v23  ;;  %v1538_v25 = vsel %vm76_vm0, %v1536_v37, 0.0 }
 0xaf0   :  { %1539 = vadd.xlane.f32.xlu1 %v1538_v25 }
 0xaf1   :  { %v1537_v26 = vmul.f32 %v1535_v24, %v1535_v24 }
 0xaf3   :  { %v1541_v0 = vsel %vm76_vm0, %v1537_v26, 0.0 }
 0xaf4   :  { %1542 = vadd.xlane.f32.xlu0 %v1541_v0 }
 0xb79   :  { %v1540_v27 = vpop.xlane.xlu1 %1539 }
 0xb7a   :  { %v1544_v28 = vmul.f32 0.03125, %v1540_v27 }
 0xb7c   :  { %v1546_v1 = vadd.f32 1e-05, %v1544_v28 }
 0xb7d   :  { %v1543_v30 = vpop.xlane.xlu0 %1542 }
 0xb7e   :  { %1892 = vrsqrt.f32 %v1546_v1  ;;  %v1545_v33 = vmul.f32 0.03125, %v1543_v30 }
 0xb80   :  { %v1547_v34 = vadd.f32 1e-05, %v1545_v33 }
 0xb82   :  { %1894 = vrsqrt.f32 %v1547_v34 }
 0xb8b   :  { %v1893_v43 = vpop.eup %1892 }
 0xb8c   :  { %v1550_v44 = vmul.f32 %v1893_v43, %v1534_v21 }
 0xb8e   :  { %v1556_v45 = vmul.f32 %v1555_v41, %v1550_v44 }
 0xb8f   :  { %v1895_v46 = vpop.eup %1894 }
 0xb90   :  { %v1551_v47 = vmul.f32 %v1895_v46, %v1535_v24  ;;  %v1562_v48 = vadd.f32 %v1561_v42, %v1556_v45 }
 0xb92   :  { %v1557_v49 = vmul.f32 %v1555_v41, %v1551_v47  ;;  %1564 = vst.msk [vmem:[#allocation3] sm:$0xff] %vm76_vm0, %v1562_v48 }
 0xb94   :  { %v1563_v50 = vadd.f32 %v1561_v42, %v1557_v49 }
 0xb96   :  { %1565 = vst.msk [vmem:[#allocation3 + $0x8] sm:$0xff] %vm76_vm0, %v1563_v50 }
 0xb97   :  { %1907 = shalt.err (!%p1904_p4)
}
 0xb98   :  { %s1925_s26 = smov 128  }
 0xb99   :  { %1577 = dma.vmem_to_hbm [thread:$0]  %s1572_s7, 256, %s2286_s8, [#allocation4], %s1925_s26, %s1925_s26, %s1921_s1  }
 0xb9a   :  { %1916 = dma.done.wait [#allocation4], 256  }
 0xb9b   :  { %1917 = vsyncadd [#allocation4], 4294967040 }
 0xb9c   :  { %1581 = vsyncpa [#allocation4], 1 }

// kernel: tpu_custom_call.1
= control target key start
LH: loop header
LB: loop body
LE: loop exit
PB: predicated region body
PF: predicated region fallthrough
CT: control target
= control target key end

     0   :  { %vm76_vm0 = vcmask 261120   ;;  %s2278_s0 = inlined_call_operand.vmem [shape: f32[16,32], index: 0, kind: input, shape index: {}]   ;;  %s2279_s1 = inlined_call_operand.vmem [shape: f32[2,8], index: 1, kind: input, shape index: {}]   ;;  %s2280_s2 = inlined_call_operand.vmem [shape: bf16[96,32], index: 2, kind: input, shape index: {}]   ;;  %s2281_s3 = inlined_call_operand.vmem [shape: bf16[32,32], index: 3, kind: input, shape index: {}]   ;;  %s2282_s4 = inlined_call_operand.vmem [shape: f32[8,32], index: 4, kind: input, shape index: {}]   ;;  %s2283_s5 = inlined_call_operand.vmem [shape: bf16[32,128], index: 5, kind: input, shape index: {}]   ;;  %s2284_s6 = inlined_call_operand.vmem [shape: f32[1,128], index: 6, kind: input, shape index: {}]   ;;  %s2285_s7 = inlined_call_operand.vmem [shape: bf16[128,32], index: 7, kind: input, shape index: {}]   ;;  %s2286_s8 = inlined_call_operand.hbm [shape: f32[16,32], index: 8, kind: output, shape index: {}]  }
   0x1   :  { %v1974_v0 = vld [vmem:[%s2278_s0] sm:$0xff]  ;;  %v1979_v1 = vld [vmem:[%s2278_s0 + $0x8] sm:$0xff]  ;;  %v1840_v5 = vld [vmem:[%s2280_s2 + $0x10] sm:$0xff]  }
   0x2   :  { %v45_v2 = vpack.c.bf16 %v1979_v1, %v1974_v0  ;;  %v1838_v3 = vld [vmem:[%s2280_s2] sm:$0xff]   ;;  %v1839_v6 = vld [vmem:[%s2280_s2 + $0x8] sm:$0xff]   ;;  %1685 = vmatprep.mubr.msk.bf16.mxu1 %vm76_vm0, %v1840_v5  ;;  %v1841_v7 = vld [vmem:[%s2280_s2 + $0x18] sm:$0xff]  }
   0x3   :  { %1681 = vmatprep.mubr.msk.bf16.mxu0 %vm76_vm0, %v1838_v3 }
   0x4   :  { %1827 = vmatprep.subr.msk.bf16.mxu0 %vm76_vm0, %v45_v2  ;;  %v96_v4 = vsel %vm76_vm0, %v45_v2, 0  ;;  %1828 = vmatprep.subr.msk.bf16.mxu1 %vm76_vm0, %v45_v2 }
   0x5   :  { %1680 = vmatpush3.bf16.xpose.msra.mxu0 %v96_v4  ;;  %1826 = vmatpush3.bf16.xpose.msra.mxu1 %v96_v4 }
   0xc   :  { %1682 = vmatmul.mubr.msk.bf16.vlgmr.msra.gmra.mxu0 %vm76_vm0, %v1839_v6  ;;  %1686 = vmatmul.mubr.msk.bf16.vlgmr.msra.gmra.mxu1 %vm76_vm0, %v1841_v7 }
   0xd   :  { %13 = vsyncpa [#allocation4], 0  ;;  %v1842_v8 = vld [vmem:[%s2280_s2 + $0x20] sm:$0xff]   ;;  %v1843_v9 = vld [vmem:[%s2280_s2 + $0x28] sm:$0xff]   ;;  %v1918_v10 = vmov 0.0   ;;  %vm1919_vm1 = vmmov 0   ;;  %v188_v34 = vlaneseq }
   0xe   :  { %1693 = vmatprep.subr.bf16.mxu1 %v1918_v10  ;;  %1717 = vmatprep.subr.bf16.mxu0 %v1918_v10  ;;  %vm212_vm2 = vcmask 1043456   ;;  %s1920_s2 = smov 120   ;;  %vm208_vm3 = vcmask 64512   ;;  %v185_v35 = vld [vmem:[%s2279_s1] sm:$0x3]  ;;  %s1921_s1 = smov 8  }
   0xf   :  { %1689 = vmatprep.mubr.msk.bf16.mxu1 %vm76_vm0, %v1842_v8  ;;  %1719 = vmatprep.mubr.msk.bf16.mxu0 %vm1919_vm1, %v1918_v10  ;;  %v2041_v36 = vshrl.u32 %v188_v34, 7  ;;  %vm186_vm4 = vcmp.eq.f32.partialorder %v185_v35, 0.0  ;;  %s1922_s22 = smov 16   ;;  %s1923_s23 = smov 24   ;;  %vm446_vm5 = vcmask 130112   ;;  %vm572_vm6 = vcmask 195712  }
  0x10   :  { %v2045_v38 = vsel %vm186_vm4, -1.767767e+19, %v1918_v10  ;;  %vm705_vm7 = vcmask 261312  }
  0x11   :  { %v190_v37 = vsub.s32 0, %v2041_v36 }
  0x13   :  { %v2050_v39 = vrot.slane %v2045_v38, %v190_v37 }
  0x14   :  { %1690 = vmatmul.mubr.msk.bf16.gmra.mxu1 %vm76_vm0, %v1843_v9 }
  0x15   :  { %1695 = vmatprep.mubr.msk.bf16.mxu1 %vm1919_vm1, %v1918_v10 }
  0xcc   :  { %v1683_v11 = vpop.f32.mrf.mxu0  ;;  %v1687_v12 = vpop.f32.mrf.mxu1 }
  0xce   :  { %v132_v13 = vpop.f32.mrf.mxu0  ;;  %v148_v14 = vpop.f32.mrf.mxu1 }
  0xd0   :  { %v1684_v15 = vpop.f32.mrf.mxu0  ;;  %v1688_v16 = vpop.f32.mrf.mxu1 }
  0xd1   :  { %v2016_v18 = vpack.c.bf16 %v1688_v16, %v1687_v12  ;;  %v180_v25 = vpack.c.bf16 %v1684_v15, %v1683_v11 }
  0xd2   :  { %v135_v17 = vpop.f32.mrf.mxu0  ;;  %v151_v20 = vpop.f32.mrf.mxu1 }
  0xd3   :  { %v179_v19 = vpack.c.bf16 %v135_v17, %v132_v13  ;;  %v2018_v21 = vpack.c.bf16 %v151_v20, %v148_v14  ;;  %v468_v22 = vsel %vm212_vm2, %v2016_v18, 0  ;;  %v594_v47 = vrot.slane %v2016_v18, 4 }
  0xd4   :  { %1718 = vmatpush3.bf16.msra.mxu0 %v468_v22  ;;  %v1691_v26 = vpop.f32.mrf.mxu1  ;;  %v575_v58 = vrot.slane %v180_v25, 4 }
  0xd5   :  { %192 = vxpose.xlu0.c.b16.start.end [1/1] (short) (narrow) %v179_v19, 16  ;;  %v316_v23 = vrot.slane %v179_v19, 4  ;;  %v214_v24 = vsel %vm212_vm2, %v2018_v21, 0  ;;  %1729 = vmatprep.subr.bf16.mxu0 %v1918_v10  ;;  %v335_v46 = vrot.slane %v2018_v21, 4  ;;  %v599_v55 = vsel %vm212_vm2, %v594_v47, 0 }
  0xd6   :  { %1694 = vmatpush3.bf16.msra.mxu1 %v214_v24  ;;  %v164_v27 = vpop.f32.mrf.mxu1 }
  0xd7   :  { %318 = vxpose.xlu1.c.b16.start.end [1/1] (short) (narrow) %v316_v23, 16  ;;  %1699 = vmatprep.subr.bf16.mxu1 %v1918_v10  ;;  %v340_v6 = vsel %vm212_vm2, %v335_v46, 0 }
  0xd8   :  { %v1692_v28 = vpop.f32.mrf.mxu1 }
  0xd9   :  { %v2028_v29 = vpack.c.bf16 %v1692_v28, %v1691_v26 }
  0xda   :  { %v167_v30 = vpop.f32.mrf.mxu1 }
  0xdb   :  { %711 = vrot.lane.b32.xlu1 %v179_v19, %s1920_s2  ;;  %v2030_v31 = vpack.c.bf16 %v167_v30, %v164_v27 }
  0xdd   :  { %v272_v32 = vsel %vm208_vm3, %v2030_v31, 0  ;;  %v395_v9 = vrot.slane %v2030_v31, 4 }
  0xdf   :  { %971 = vrot.lane.b32.xlu1 %v180_v25, %s1920_s2  ;;  %v400_v12 = vsel %vm208_vm3, %v395_v9, 0 }
 0x137   :  { %v200_v33 = vpop.trf.xlu0 }
 0x138   :  { %1696 = vmatmul.mubr.msk.bf16.vlgmr.msra.gmra.mxu1 %vm208_vm3, %v200_v33 }
 0x139   :  { %1700 = vmatpush3.bf16.xpose.msra.mxu1 %v272_v32  ;;  %1701 = vmatprep.mubr.msk.bf16.mxu1 %vm1919_vm1, %v1918_v10  ;;  %v326_v48 = vpop.trf.xlu1  ;;  %v709_v32 = vsub.s32 1, %v2041_v36 }
 0x13a   :  { %1705 = vmatprep.subr.bf16.mxu1 %v1918_v10 }
 0x14d   :  { %v712_v49 = vpop.permute.xlu1 %711 }
 0x151   :  { %v972_v59 = vpop.permute.xlu1 %971 }
 0x1f8   :  { %v250_v40 = vpop.f32.mrf.mxu1 }
 0x1f9   :  { %v251_v41 = vadd.f32 %v250_v40, %v2050_v39 }
 0x1fa   :  { %v1697_v42 = vpop.f32.mrf.mxu1 }
 0x1fb   :  { %v256_v43 = vsel %vm208_vm3, %v251_v41, -inf }
 0x1fc   :  { %257 = vmax.xlane.f32.xlu0 %v256_v43  ;;  %v253_v44 = vpop.f32.mrf.mxu1 }
 0x1fe   :  { %v1698_v45 = vpop.f32.mrf.mxu1 }
 0x212   :  { %839 = vrot.lane.b32.xlu0 %v316_v23, %s1920_s2 }
 0x230   :  { %448 = vxpose.xlu0.c.b16.start.end [1/1] (short) (narrow) %v180_v25, 16 }
 0x239   :  { %858 = vrot.lane.b32.xlu0 %v335_v46, %s1920_s2 }
 0x23d   :  { %1122 = vrot.lane.b32.xlu0 %v594_v47, %s1920_s2 }
 0x25b   :  { %714 = vxpose.xlu0.c.b16.start.end [1/1] (short) (narrow) %v712_v49, 16 }
 0x285   :  { %v258_v50 = vpop.xlane.xlu0 %257 }
 0x286   :  { %v259_v51 = vsub.f32 %v251_v41, %v258_v50  ;;  %v710_v41 = vrot.slane %v2045_v38, %v709_v32 }
 0x288   :  { %v260_v52 = vmul.f32 1.442695, %v259_v51 }
 0x289   :  { %v840_v53 = vpop.permute.xlu0 %839 }
 0x28a   :  { %1856 = vpow2.f32 %v260_v52 }
 0x292   :  { %v456_v54 = vpop.trf.xlu0 }
 0x293   :  { %1720 = vmatmul.mubr.msk.bf16.vlgmr.msra.gmra.mxu0 %vm208_vm3, %v456_v54 }
 0x294   :  { %1730 = vmatpush3.bf16.msra.mxu0 %v599_v55  ;;  %1731 = vmatprep.mubr.msk.bf16.mxu0 %vm1919_vm1, %v1918_v10 }
 0x295   :  { %1741 = vmatprep.subr.bf16.mxu0 %v1918_v10 }
 0x297   :  { %v1857_v56 = vpop.eup %1856 }
 0x298   :  { %v262_v57 = vsel %vm208_vm3, %v1857_v56, 0.0 }
 0x299   :  { %263 = vadd.xlane.f32.xlu1 %v262_v57 }
 0x2aa   :  { %1103 = vrot.lane.b32.xlu1 %v575_v58, %s1920_s2 }
 0x2ab   :  { %v859_v3 = vpop.permute.xlu0 %858 }
 0x2ac   :  { %v864_v14 = vsel %vm212_vm2, %v859_v3, 0 }
 0x2ae   :  { %730 = vrot.lane.b32.xlu1 %v2018_v21, %s1920_s2 }
 0x2af   :  { %v1123_v11 = vpop.permute.xlu0 %1122 }
 0x2b2   :  { %990 = vrot.lane.b32.xlu1 %v2016_v18, %s1920_s2  ;;  %v1128_v18 = vsel %vm212_vm2, %v1123_v11, 0 }
 0x2bd   :  { %v722_v13 = vpop.trf.xlu0 }
 0x2d5   :  { %577 = vxpose.xlu1.c.b16.start.end [1/1] (short) (narrow) %v575_v58, 16 }
 0x2d9   :  { %842 = vxpose.xlu1.c.b16.start.end [1/1] (short) (narrow) %v840_v53, 16 }
 0x2dd   :  { %974 = vxpose.xlu1.c.b16.start.end [1/1] (short) (narrow) %v972_v59, 16 }
 0x322   :  { %v264_v60 = vpop.xlane.xlu1 %263 }
 0x323   :  { %1858 = vrcp.f32 %v264_v60 }
 0x326   :  { %v1104_v61 = vpop.permute.xlu1 %1103 }
 0x327   :  { %1106 = vxpose.xlu0.c.b16.start.end [1/1] (short) (narrow) %v1104_v61, 16 }
 0x32a   :  { %v731_v62 = vpop.permute.xlu1 %730 }
 0x32b   :  { %v736_v8 = vsel %vm212_vm2, %v731_v62, 0 }
 0x32e   :  { %v991_v4 = vpop.permute.xlu1 %990 }
 0x32f   :  { %v996_v16 = vsel %vm212_vm2, %v991_v4, 0 }
 0x330   :  { %v1859_v63 = vpop.eup %1858 }
 0x331   :  { %v266_v2 = vmul.f32 %v1859_v63, %v1857_v56 }
 0x333   :  { %v267_v5 = vpack.c.bf16 %v266_v2, %v266_v2 }
 0x335   :  { %1702 = vmatmul.mubr.msk.bf16.vlgmr.msra.gmra.mxu1 %vm208_vm3, %v267_v5 }
 0x336   :  { %1706 = vmatpush3.bf16.msra.mxu1 %v340_v6  ;;  %1707 = vmatprep.mubr.msk.bf16.mxu1 %vm1919_vm1, %v1918_v10 }
 0x337   :  { %v585_v7 = vpop.trf.xlu1  ;;  %1711 = vmatprep.subr.bf16.mxu1 %v1918_v10 }
 0x338   :  { %1732 = vmatmul.mubr.msk.bf16.vlgmr.msra.gmra.mxu0 %vm208_vm3, %v585_v7 }
 0x339   :  { %1742 = vmatpush3.bf16.msra.mxu0 %v736_v8  ;;  %1743 = vmatprep.mubr.msk.bf16.mxu0 %vm1919_vm1, %v1918_v10 }
 0x33a   :  { %1753 = vmatprep.subr.bf16.mxu0 %v1918_v10 }
 0x33b   :  { %v850_v15 = vpop.trf.xlu1 }
 0x33d   :  { %1708 = vmatmul.mubr.msk.bf16.vlgmr.msra.gmra.mxu1 %vm208_vm3, %v326_v48 }
 0x33e   :  { %1712 = vmatpush3.bf16.xpose.msra.mxu1 %v400_v12  ;;  %1713 = vmatprep.mubr.msk.bf16.mxu1 %vm1919_vm1, %v1918_v10 }
 0x33f   :  { %1723 = vmatprep.subr.bf16.mxu1 %v1918_v10  ;;  %v982_v17 = vpop.trf.xlu1 }
 0x340   :  { %1744 = vmatmul.mubr.msk.bf16.vlgmr.msra.gmra.mxu0 %vm208_vm3, %v722_v13 }
 0x341   :  { %1754 = vmatpush3.bf16.msra.mxu0 %v864_v14  ;;  %1755 = vmatprep.mubr.msk.bf16.mxu0 %vm1919_vm1, %v1918_v10 }
 0x342   :  { %1765 = vmatprep.subr.bf16.mxu0 %v1918_v10 }
 0x348   :  { %1756 = vmatmul.mubr.msk.bf16.vlgmr.msra.gmra.mxu0 %vm208_vm3, %v850_v15 }
 0x349   :  { %1766 = vmatpush3.bf16.msra.mxu0 %v996_v16  ;;  %1767 = vmatprep.mubr.msk.bf16.mxu0 %vm1919_vm1, %v1918_v10 }
 0x34a   :  { %1777 = vmatprep.subr.bf16.mxu0 %v1918_v10 }
 0x350   :  { %1768 = vmatmul.mubr.msk.bf16.vlgmr.msra.gmra.mxu0 %vm208_vm3, %v982_v17 }
 0x351   :  { %1778 = vmatpush3.bf16.msra.mxu0 %v1128_v18  ;;  %1779 = vmatprep.mubr.msk.bf16.mxu0 %vm1919_vm1, %v1918_v10 }
 0x352   :  { %1789 = vmatprep.subr.bf16.mxu0 %v1918_v10 }
 0x353   :  { %v504_v19 = vpop.f32.mrf.mxu0 }
 0x354   :  { %v505_v20 = vadd.f32 %v504_v19, %v2050_v39 }
 0x355   :  { %v1721_v21 = vpop.f32.mrf.mxu0 }
 0x356   :  { %v510_v22 = vsel %vm208_vm3, %v505_v20, -inf }
 0x357   :  { %511 = vmax.xlane.f32.xlu0 %v510_v22  ;;  %v507_v23 = vpop.f32.mrf.mxu0 }
 0x359   :  { %v1722_v24 = vpop.f32.mrf.mxu0 }
 0x389   :  { %v1114_v25 = vpop.trf.xlu0 }
 0x38a   :  { %1780 = vmatmul.mubr.msk.bf16.vlgmr.msra.gmra.mxu0 %vm208_vm3, %v1114_v25 }
 0x38b   :  { %1793 = vmatprep.mubr.msk.bf16.mxu0 %vm1919_vm1, %v1918_v10 }
 0x3e0   :  { %v512_v4 = vpop.xlane.xlu0 %511 }
 0x3e1   :  { %v513_v5 = vsub.f32 %v505_v20, %v512_v4 }
 0x3e3   :  { %v514_v6 = vmul.f32 1.442695, %v513_v5 }
 0x3e5   :  { %1860 = vpow2.f32 %v514_v6 }
 0x3f2   :  { %v2121_v13 = vpop.eup %1860 }
 0x3f3   :  { %v516_v16 = vsel %vm208_vm3, %v2121_v13, 0.0 }
 0x3f5   :  { %v308_v26 = vpop.f32.mrf.mxu1 }
 0x3f6   :  { %314 = vst.msk [vmem:[#allocation2] sm:$0xff] %vm208_vm3, %v308_v26 }
 0x3f7   :  { %v1703_v27 = vpop.f32.mrf.mxu1 }
 0x3f8   :  { %v635_v28 = vpop.f32.mrf.mxu0 }
 0x3f9   :  { %v311_v30 = vpop.f32.mrf.mxu1  ;;  %v636_v42 = vadd.f32 %v635_v28, %v2050_v39 }
 0x3fa   :  { %v1733_v33 = vpop.f32.mrf.mxu0 }
 0x3fb   :  { %v1704_v34 = vpop.f32.mrf.mxu1  ;;  %v641_v51 = vsel %vm208_vm3, %v636_v42, -inf }
 0x3fc   :  { %v638_v35 = vpop.f32.mrf.mxu0 }
 0x3fd   :  { %v376_v40 = vpop.f32.mrf.mxu1 }
 0x3fe   :  { %v377_v43 = vadd.f32 %v376_v40, %v2050_v39  ;;  %v1734_v44 = vpop.f32.mrf.mxu0 }
 0x3ff   :  { %v1709_v45 = vpop.f32.mrf.mxu1 }
 0x400   :  { %v772_v46 = vpop.f32.mrf.mxu0  ;;  %v382_v47 = vsel %vm208_vm3, %v377_v43, -inf }
 0x401   :  { %v773_v48 = vadd.f32 %v772_v46, %v710_v41  ;;  %v379_v49 = vpop.f32.mrf.mxu1  ;;  %383 = vmax.xlane.f32.xlu1 %v382_v47 }
 0x402   :  { %v1745_v50 = vpop.f32.mrf.mxu0 }
 0x403   :  { %v1710_v52 = vpop.f32.mrf.mxu1  ;;  %v778_v53 = vsel %vm208_vm3, %v773_v48, -inf }
 0x404   :  { %779 = vmax.xlane.f32.xlu0 %v778_v53  ;;  %v775_v38 = vpop.f32.mrf.mxu0 }
 0x405   :  { %642 = vmax.xlane.f32.xlu1 %v641_v51  ;;  %v654_v38 = vrot.slane %v2028_v29, 4 }
 0x406   :  { %v1746_v54 = vpop.f32.mrf.mxu0 }
 0x408   :  { %v900_v55 = vpop.f32.mrf.mxu0 }
 0x409   :  { %v901_v39 = vadd.f32 %v900_v55, %v710_v41 }
 0x40a   :  { %v1757_v56 = vpop.f32.mrf.mxu0 }
 0x40b   :  { %v906_v57 = vsel %vm208_vm3, %v901_v39, -inf }
 0x40c   :  { %907 = vmax.xlane.f32.xlu1 %v906_v57  ;;  %v903_v58 = vpop.f32.mrf.mxu0 }
 0x40e   :  { %v1758_v59 = vpop.f32.mrf.mxu0 }
 0x410   :  { %v1032_v60 = vpop.f32.mrf.mxu0 }
 0x411   :  { %v1033_v61 = vadd.f32 %v1032_v60, %v710_v41 }
 0x412   :  { %v1769_v62 = vpop.f32.mrf.mxu0 }
 0x413   :  { %v1038_v63 = vsel %vm208_vm3, %v1033_v61, -inf }
 0x414   :  { %1039 = vmax.xlane.f32.xlu0 %v1038_v63  ;;  %v1035_v2 = vpop.f32.mrf.mxu0 }
 0x415   :  { %v659_v2 = vsel %vm208_vm3, %v654_v38, 0 }
 0x416   :  { %v1770_v3 = vpop.f32.mrf.mxu0 }
 0x44a   :  { %v1164_v7 = vpop.f32.mrf.mxu0 }
 0x44b   :  { %v1165_v8 = vadd.f32 %v1164_v7, %v710_v41 }
 0x44c   :  { %v1781_v11 = vpop.f32.mrf.mxu0 }
 0x44d   :  { %v1170_v12 = vsel %vm208_vm3, %v1165_v8, -inf }
 0x44e   :  { %1171 = vmax.xlane.f32.xlu1 %v1170_v12  ;;  %v1167_v14 = vpop.f32.mrf.mxu0 }
 0x450   :  { %v1782_v15 = vpop.f32.mrf.mxu0 }
 0x452   :  { %517 = vadd.xlane.f32.xlu1 %v516_v16 }
 0x48a   :  { %v384_v17 = vpop.xlane.xlu1 %383 }
 0x48b   :  { %v385_v18 = vsub.f32 %v377_v43, %v384_v17 }
 0x48d   :  { %v386_v19 = vmul.f32 1.442695, %v385_v18  ;;  %v780_v20 = vpop.xlane.xlu0 %779 }
 0x48e   :  { %v781_v21 = vsub.f32 %v773_v48, %v780_v20  ;;  %v643_v22 = vpop.xlane.xlu1 %642 }
 0x48f   :  { %1862 = vpow2.f32 %v386_v19  ;;  %v644_v23 = vsub.f32 %v636_v42, %v643_v22 }
 0x490   :  { %v782_v24 = vmul.f32 1.442695, %v781_v21 }
 0x491   :  { %v645_v25 = vmul.f32 1.442695, %v644_v23 }
 0x492   :  { %1864 = vpow2.f32 %v782_v24 }
 0x493   :  { %1866 = vpow2.f32 %v645_v25 }
 0x495   :  { %v908_v26 = vpop.xlane.xlu1 %907 }
 0x496   :  { %v909_v27 = vsub.f32 %v901_v39, %v908_v26 }
 0x498   :  { %v910_v28 = vmul.f32 1.442695, %v909_v27 }
 0x49a   :  { %1868 = vpow2.f32 %v910_v28 }
 0x49c   :  { %v1863_v30 = vpop.eup %1862 }
 0x49d   :  { %v1040_v33 = vpop.xlane.xlu0 %1039  ;;  %v388_v34 = vsel %vm208_vm3, %v1863_v30, 0.0 }
 0x49e   :  { %v1041_v35 = vsub.f32 %v1033_v61, %v1040_v33  ;;  %389 = vadd.xlane.f32.xlu0 %v388_v34 }
 0x49f   :  { %v1865_v40 = vpop.eup %1864 }
 0x4a0   :  { %v1867_v41 = vpop.eup %1866  ;;  %v1042_v43 = vmul.f32 1.442695, %v1041_v35  ;;  %v784_v44 = vsel %vm208_vm3, %v1865_v40, 0.0 }
 0x4a1   :  { %785 = vadd.xlane.f32.xlu1 %v784_v44  ;;  %v647_v42 = vsel %vm208_vm3, %v1867_v41, 0.0 }
 0x4a2   :  { %1870 = vpow2.f32 %v1042_v43  ;;  %648 = vadd.xlane.f32.xlu0 %v647_v42 }
 0x4a7   :  { %v2128_v45 = vpop.eup %1868 }
 0x4a8   :  { %v912_v46 = vsel %vm208_vm3, %v2128_v45, 0.0 }
 0x4a9   :  { %913 = vadd.xlane.f32.xlu0 %v912_v46 }
 0x4af   :  { %v2132_v47 = vpop.eup %1870 }
 0x4b0   :  { %v1044_v48 = vsel %vm208_vm3, %v2132_v47, 0.0 }
 0x4b1   :  { %1045 = vadd.xlane.f32.xlu1 %v1044_v48 }
 0x4bf   :  { %790 = vrot.lane.b32.xlu0 %v2030_v31, %s1920_s2  ;;  %v526_v31 = vsel %vm208_vm3, %v2028_v29, 0 }
 0x4c3   :  { %1050 = vrot.lane.b32.xlu0 %v2028_v29, %s1920_s2 }
 0x4d7   :  { %v1172_v49 = vpop.xlane.xlu1 %1171 }
 0x4d8   :  { %v1173_v50 = vsub.f32 %v1165_v8, %v1172_v49 }
 0x4da   :  { %v1174_v51 = vmul.f32 1.442695, %v1173_v50 }
 0x4db   :  { %v518_v55 = vpop.xlane.xlu1 %517 }
 0x4dc   :  { %1872 = vpow2.f32 %v1174_v51 }
 0x4e9   :  { %v2140_v52 = vpop.eup %1872 }
 0x4ea   :  { %v1176_v53 = vsel %vm208_vm3, %v2140_v52, 0.0 }
 0x4eb   :  { %1177 = vadd.xlane.f32.xlu1 %v1176_v53 }
 0x4fc   :  { %918 = vrot.lane.b32.xlu1 %v395_v9, %s1920_s2 }
 0x500   :  { %1182 = vrot.lane.b32.xlu1 %v654_v38, %s1920_s2  ;;  %v1844_v38 = vld [vmem:[%s2281_s3 + $0x8] sm:$0xff]  }
 0x501   :  { %1790 = vmatpush3.bf16.msra.mxu0 %v1844_v38 }
 0x502   :  { %1791 = vmatprep.subr.bf16.mxu0 %v1918_v10 }
 0x527   :  { %v390_v54 = vpop.xlane.xlu0 %389 }
 0x528   :  { %1874 = vrcp.f32 %v390_v54 }
 0x529   :  { %1876 = vrcp.f32 %v518_v55  ;;  %v1845_v55 = vld [vmem:[%s2281_s3] sm:$0xff]  }
 0x52a   :  { %v786_v60 = vpop.xlane.xlu1 %785  ;;  %1792 = vmatpush3.bf16.msra.mxu0 %v1845_v55 }
 0x52b   :  { %v649_v39 = vpop.xlane.xlu0 %648  ;;  %1805 = vmatprep.subr.bf16.mxu0 %v1918_v10 }
 0x52c   :  { %1878 = vrcp.f32 %v649_v39 }
 0x52d   :  { %1880 = vrcp.f32 %v786_v60 }
 0x532   :  { %v914_v63 = vpop.xlane.xlu0 %913 }
 0x533   :  { %1882 = vrcp.f32 %v914_v63 }
 0x535   :  { %v1875_v56 = vpop.eup %1874 }
 0x536   :  { %v392_v57 = vmul.f32 %v1875_v56, %v1863_v30  ;;  %v1877_v59 = vpop.eup %1876  ;;  %v791_v3 = vpop.permute.xlu0 %790 }
 0x537   :  { %v520_v9 = vmul.f32 %v1877_v59, %v2121_v13  ;;  %v796_v6 = vsel %vm208_vm3, %v791_v3, 0 }
 0x538   :  { %v393_v58 = vpack.c.bf16 %v392_v57, %v392_v57 }
 0x539   :  { %v521_v61 = vpack.c.bf16 %v520_v9, %v520_v9  ;;  %v1879_v62 = vpop.eup %1878 }
 0x53a   :  { %1714 = vmatmul.mubr.msk.bf16.vlgmr.msra.gmra.mxu1 %vm208_vm3, %v393_v58  ;;  %v651_v29 = vmul.f32 %v1879_v62, %v1867_v41  ;;  %v1881_v5 = vpop.eup %1880  ;;  %v1046_v11 = vpop.xlane.xlu1 %1045 }
 0x53b   :  { %1724 = vmatpush3.bf16.xpose.msra.mxu1 %v526_v31  ;;  %1725 = vmatprep.mubr.msk.bf16.mxu1 %vm1919_vm1, %v1918_v10  ;;  %v788_v7 = vmul.f32 %v1881_v5, %v1865_v40  ;;  %1884 = vrcp.f32 %v1046_v11  ;;  %v1051_v17 = vpop.permute.xlu0 %1050 }
 0x53c   :  { %1735 = vmatprep.subr.bf16.mxu1 %v1918_v10  ;;  %v652_v4 = vpack.c.bf16 %v651_v29, %v651_v29  ;;  %v1056_v20 = vsel %vm208_vm3, %v1051_v17, 0 }
 0x53d   :  { %v789_v8 = vpack.c.bf16 %v788_v7, %v788_v7  ;;  %v2204_v7 = vld [vmem:[%s2282_s4] sm:$0xff] }
 0x540   :  { %v1883_v13 = vpop.eup %1882 }
 0x541   :  { %v916_v16 = vmul.f32 %v1883_v13, %v2128_v45 }
 0x542   :  { %1726 = vmatmul.mubr.msk.bf16.vlgmr.msra.gmra.mxu1 %vm208_vm3, %v521_v61 }
 0x543   :  { %1736 = vmatpush3.bf16.xpose.msra.mxu1 %v659_v2  ;;  %1737 = vmatprep.mubr.msk.bf16.mxu1 %vm1919_vm1, %v1918_v10  ;;  %v917_v18 = vpack.c.bf16 %v916_v16, %v916_v16 }
 0x544   :  { %1747 = vmatprep.subr.bf16.mxu1 %v1918_v10 }
 0x548   :  { %v1885_v19 = vpop.eup %1884 }
 0x549   :  { %v1048_v21 = vmul.f32 %v1885_v19, %v2132_v47 }
 0x54a   :  { %1738 = vmatmul.mubr.msk.bf16.vlgmr.msra.gmra.mxu1 %vm208_vm3, %v652_v4 }
 0x54b   :  { %1748 = vmatpush3.bf16.xpose.msra.mxu1 %v796_v6  ;;  %1749 = vmatprep.mubr.msk.bf16.mxu1 %vm1919_vm1, %v1918_v10  ;;  %v1049_v23 = vpack.c.bf16 %v1048_v21, %v1048_v21 }
 0x54c   :  { %1759 = vmatprep.subr.bf16.mxu1 %v1918_v10 }
 0x552   :  { %1750 = vmatmul.mubr.msk.bf16.vlgmr.msra.gmra.mxu1 %vm208_vm3, %v789_v8  ;;  %v1246_v8 = vrot.slane %v2204_v7, %v190_v37 }
 0x553   :  { %1761 = vmatprep.mubr.msk.bf16.mxu1 %vm1919_vm1, %v1918_v10 }
 0x574   :  { %v1178_v12 = vpop.xlane.xlu1 %1177 }
 0x575   :  { %1886 = vrcp.f32 %v1178_v12 }
 0x578   :  { %v919_v14 = vpop.permute.xlu1 %918 }
 0x579   :  { %v924_v15 = vsel %vm208_vm3, %v919_v14, 0 }
 0x57a   :  { %1760 = vmatpush3.bf16.xpose.msra.mxu1 %v924_v15 }
 0x57b   :  { %1771 = vmatprep.subr.bf16.mxu1 %v1918_v10 }
 0x57c   :  { %v1183_v22 = vpop.permute.xlu1 %1182 }
 0x57d   :  { %v1188_v25 = vsel %vm208_vm3, %v1183_v22, 0 }
 0x581   :  { %1762 = vmatmul.mubr.msk.bf16.vlgmr.msra.gmra.mxu1 %vm208_vm3, %v917_v18 }
 0x582   :  { %1772 = vmatpush3.bf16.xpose.msra.mxu1 %v1056_v20  ;;  %1773 = vmatprep.mubr.msk.bf16.mxu1 %vm1919_vm1, %v1918_v10  ;;  %v1887_v24 = vpop.eup %1886 }
 0x583   :  { %1783 = vmatprep.subr.bf16.mxu1 %v1918_v10  ;;  %v1180_v26 = vmul.f32 %v1887_v24, %v2140_v52 }
 0x585   :  { %v1181_v27 = vpack.c.bf16 %v1180_v26, %v1180_v26 }
 0x589   :  { %1774 = vmatmul.mubr.msk.bf16.vlgmr.msra.gmra.mxu1 %vm208_vm3, %v1049_v23 }
 0x58a   :  { %1784 = vmatpush3.bf16.xpose.msra.mxu1 %v1188_v25  ;;  %1785 = vmatprep.mubr.msk.bf16.mxu1 %vm1919_vm1, %v1918_v10 }
 0x58b   :  { %1797 = vmatprep.subr.bf16.mxu1 %v1918_v10 }
 0x591   :  { %1786 = vmatmul.mubr.msk.bf16.vlgmr.msra.gmra.mxu1 %vm208_vm3, %v1181_v27 }
 0x592   :  { %1801 = vmatprep.mubr.msk.bf16.mxu1 %vm1919_vm1, %v1918_v10 }
 0x5fa   :  { %v436_v28 = vpop.f32.mrf.mxu1 }
 0x5fb   :  { %443 = vrot.lane.b32.xlu0 %v436_v28, %s1921_s1 }
 0x5fc   :  { %v1715_v30 = vpop.f32.mrf.mxu1 }
 0x5fd   :  { %v1847_v30 = vld [vmem:[%s2283_s5] sm:$0xff]  }
 0x5fe   :  { %v439_v33 = vpop.f32.mrf.mxu1 }
 0x5ff   :  { %v1848_v33 = vld [vmem:[%s2285_s7 + $0x38] sm:$0xff]  }
 0x600   :  { %v1716_v34 = vpop.f32.mrf.mxu1 }
 0x601   :  { %v1849_v34 = vld [vmem:[%s2285_s7 + $0x30] sm:$0xff]  }
 0x602   :  { %v562_v35 = vpop.f32.mrf.mxu1 }
 0x603   :  { %569 = vrot.lane.b32.xlu0 %v562_v35, %s1922_s22  ;;  %v1850_v35 = vld [vmem:[%s2285_s7 + $0x28] sm:$0xff]  }
 0x604   :  { %v1727_v40 = vpop.f32.mrf.mxu1 }
 0x605   :  { %v1851_v40 = vld [vmem:[%s2285_s7 + $0x20] sm:$0xff]  }
 0x606   :  { %v565_v41 = vpop.f32.mrf.mxu1 }
 0x607   :  { %v1852_v41 = vld [vmem:[%s2285_s7 + $0x18] sm:$0xff]  }
 0x608   :  { %v1728_v43 = vpop.f32.mrf.mxu1 }
 0x60a   :  { %v695_v44 = vpop.f32.mrf.mxu1 }
 0x60b   :  { %702 = vrot.lane.b32.xlu0 %v695_v44, %s1923_s23 }
 0x60c   :  { %v1739_v42 = vpop.f32.mrf.mxu1 }
 0x60e   :  { %v698_v45 = vpop.f32.mrf.mxu1 }
 0x610   :  { %v1740_v46 = vpop.f32.mrf.mxu1 }
 0x612   :  { %v832_v47 = vpop.f32.mrf.mxu1 }
 0x613   :  { %838 = vst.msk [vmem:[#allocation2 + $0x8] sm:$0xff] %vm208_vm3, %v832_v47 }
 0x614   :  { %v1751_v48 = vpop.f32.mrf.mxu1 }
 0x616   :  { %v835_v49 = vpop.f32.mrf.mxu1 }
 0x618   :  { %v1752_v50 = vpop.f32.mrf.mxu1 }
 0x619   :  { %v1335_v50 = vrot.slane %v2204_v7, %v709_v32  ;;  %v1854_v32 = vld [vmem:[%s2285_s7 + $0x8] sm:$0xff]  }
 0x641   :  { %v960_v51 = vpop.f32.mrf.mxu1 }
 0x642   :  { %967 = vrot.lane.b32.xlu1 %v960_v51, %s1921_s1  ;;  %v1340_v51 = vsub.s32 2, %v2041_v36 }
 0x643   :  { %v1763_v52 = vpop.f32.mrf.mxu1 }
 0x645   :  { %v963_v53 = vpop.f32.mrf.mxu1 }
 0x647   :  { %v1764_v54 = vpop.f32.mrf.mxu1 }
 0x648   :  { %v1341_v54 = vrot.slane %v2204_v7, %v1340_v51 }
 0x649   :  { %v1092_v39 = vpop.f32.mrf.mxu1 }
 0x64a   :  { %1099 = vrot.lane.b32.xlu1 %v1092_v39, %s1922_s22 }
 0x64b   :  { %v1775_v56 = vpop.f32.mrf.mxu1 }
 0x64d   :  { %v1095_v57 = vpop.f32.mrf.mxu1 }
 0x64f   :  { %v1776_v58 = vpop.f32.mrf.mxu1 }
 0x650   :  { %v1853_v58 = vld [vmem:[%s2285_s7 + $0x10] sm:$0xff]  }
 0x651   :  { %v1224_v59 = vpop.f32.mrf.mxu1 }
 0x652   :  { %1231 = vrot.lane.b32.xlu1 %v1224_v59, %s1923_s23  ;;  %v1855_v59 = vld [vmem:[%s2285_s7] sm:$0xff]  }
 0x653   :  { %v1787_v60 = vpop.f32.mrf.mxu1 }
 0x654   :  { %v1613_v60 = vld [vmem:[%s2284_s6] ss:$0 sm:$0xff]  ;;  %s1924_s6 = smov [#allocation3]  }
 0x655   :  { %v1227_v31 = vpop.f32.mrf.mxu1  ;;  %s1571_s7 = sshll.u32 %s1924_s6, 4  ;;  %s1572_s7 = int_to_ptr.vmem [resolvable:$true] %s1571_s7 }
 0x656   :  { %s1896_s25 = scalar_lea.vmem %s1572_s7, 256  ;;  %p1901_p1 = scmp.lt.s32.totalorder %s1572_s7, %s1572_s7 }
 0x657   :  { %v1788_v9 = vpop.f32.mrf.mxu1  ;;  %p1897_p0 = scmp.ne.s32.totalorder %s1572_s7, %s1896_s25  ;;  %p1902_p2 = scmp.lt.s32.totalorder %s1896_s25, %s1896_s25 }
 0x659   :  { %p1903_p3 = por %p1902_p2, %p1901_p1 }
 0x65b   :  { %p1904_p4 = pnand %p1903_p3, %p1897_p0 }
 0x66d   :  { %v444_v61 = vpop.permute.xlu0 %443 }
 0x66e   :  { %447 = vst.msk [vmem:[#allocation2] sm:$0xff] %vm446_vm5, %v444_v61 }
 0x675   :  { %v570_v62 = vpop.permute.xlu0 %569 }
 0x676   :  { %573 = vst.msk [vmem:[#allocation2] sm:$0xff] %vm572_vm6, %v570_v62 }
 0x67d   :  { %v703_v63 = vpop.permute.xlu0 %702 }
 0x67e   :  { %706 = vst.msk [vmem:[#allocation2] sm:$0xff] %vm705_vm7, %v703_v63 }
 0x685   :  { %v1236_v4 = vld [vmem:[#allocation2] sm:$0xff] }
 0x6b4   :  { %v968_v2 = vpop.permute.xlu1 %967 }
 0x6b5   :  { %970 = vst.msk [vmem:[#allocation2 + $0x8] sm:$0xff] %vm446_vm5, %v968_v2 }
 0x6bc   :  { %v1100_v29 = vpop.permute.xlu1 %1099 }
 0x6bd   :  { %1102 = vst.msk [vmem:[#allocation2 + $0x8] sm:$0xff] %vm572_vm6, %v1100_v29 }
 0x6c4   :  { %v1232_v3 = vpop.permute.xlu1 %1231 }
 0x6c5   :  { %1234 = vst.msk [vmem:[#allocation2 + $0x8] sm:$0xff] %vm705_vm7, %v1232_v3 }
 0x6cc   :  { %v1237_v5 = vld [vmem:[#allocation2 + $0x8] sm:$0xff] }
 0x6cd   :  { %v1238_v6 = vpack.c.bf16 %v1237_v5, %v1236_v4 }
 0x6cf   :  { %1794 = vmatmul.mubr.msk.bf16.vlgmr.msra.gmra.mxu0 %vm76_vm0, %v1238_v6 }
 0x6d0   :  { %1821 = vmatprep.mubr.msk.bf16.mxu0 %vm1919_vm1, %v1918_v10  ;;  %1806 = vmatpush3.bf16.msra.mxu0 %v1848_v33 }
 0x6d1   :  { %1807 = vmatprep.subr.bf16.mxu0 %v1918_v10 }
 0x6d4   :  { %1808 = vmatpush3.bf16.msra.mxu0 %v1849_v34 }
 0x6d5   :  { %1809 = vmatprep.subr.bf16.mxu0 %v1918_v10 }
 0x6d8   :  { %1810 = vmatpush3.bf16.msra.mxu0 %v1850_v35  ;;  %v1554_v35 = vsub.s32 4, %v2041_v36 }
 0x6d9   :  { %1811 = vmatprep.subr.bf16.mxu0 %v1918_v10 }
 0x6dc   :  { %1812 = vmatpush3.bf16.msra.mxu0 %v1851_v40  ;;  %v1560_v40 = vsub.s32 5, %v2041_v36 }
 0x6dd   :  { %1813 = vmatprep.subr.bf16.mxu0 %v1918_v10 }
 0x6e0   :  { %1814 = vmatpush3.bf16.msra.mxu0 %v1852_v41  ;;  %v1555_v41 = vrot.slane %v2204_v7, %v1554_v35 }
 0x6e1   :  { %1815 = vmatprep.subr.bf16.mxu0 %v1918_v10 }
 0x6e4   :  { %1816 = vmatpush3.bf16.msra.mxu0 %v1853_v58 }
 0x6e5   :  { %1817 = vmatprep.subr.bf16.mxu0 %v1918_v10 }
 0x6e8   :  { %1818 = vmatpush3.bf16.msra.mxu0 %v1854_v32 }
 0x6e9   :  { %1819 = vmatprep.subr.bf16.mxu0 %v1918_v10 }
 0x6ec   :  { %1820 = vmatpush3.bf16.msra.mxu0 %v1855_v59 }
 0x78f   :  { %v1296_v11 = vpop.f32.mrf.mxu0 }
 0x790   :  { %v1297_v12 = vadd.f32 %v1296_v11, %v1246_v8 }
 0x791   :  { %v1795_v13 = vpop.f32.mrf.mxu0 }
 0x792   :  { %v1303_v14 = vadd.f32 %v1297_v12, %v1974_v0 }
 0x793   :  { %v1299_v15 = vpop.f32.mrf.mxu0 }
 0x794   :  { %v1300_v16 = vadd.f32 %v1299_v15, %v1246_v8  ;;  %v1305_v17 = vsel %vm76_vm0, %v1303_v14, 0.0 }
 0x795   :  { %1306 = vadd.xlane.f32.xlu0 %v1305_v17  ;;  %v1796_v18 = vpop.f32.mrf.mxu0 }
 0x796   :  { %v1304_v19 = vadd.f32 %v1300_v16, %v1979_v1  ;;  %v1846_v1 = vld [vmem:[%s2283_s5 + $0x8] sm:$0xff]  }
 0x797   :  { %1798 = vmatpush3.bf16.msra.mxu1 %v1846_v1 }
 0x798   :  { %v1308_v20 = vsel %vm76_vm0, %v1304_v19, 0.0  ;;  %1799 = vmatprep.subr.bf16.mxu1 %v1918_v10  ;;  %v1433_v10 = vsub.s32 3, %v2041_v36 }
 0x799   :  { %1309 = vadd.xlane.f32.xlu1 %v1308_v20 }
 0x79a   :  { %v1434_v5 = vrot.slane %v2204_v7, %v1433_v10 }
 0x79b   :  { %1800 = vmatpush3.bf16.msra.mxu1 %v1847_v30 }
 0x81e   :  { %v1307_v21 = vpop.xlane.xlu0 %1306 }
 0x81f   :  { %v1312_v22 = vmul.f32 0.03125, %v1307_v21 }
 0x821   :  { %v1314_v23 = vsub.f32 %v1303_v14, %v1312_v22 }
 0x822   :  { %v1310_v37 = vpop.xlane.xlu1 %1309 }
 0x823   :  { %v1313_v24 = vmul.f32 0.03125, %v1310_v37  ;;  %v1316_v25 = vmul.f32 %v1314_v23, %v1314_v23 }
 0x825   :  { %v1315_v26 = vsub.f32 %v1304_v19, %v1313_v24  ;;  %v1318_v0 = vsel %vm76_vm0, %v1316_v25, 0.0 }
 0x826   :  { %1319 = vadd.xlane.f32.xlu0 %v1318_v0 }
 0x827   :  { %v1317_v27 = vmul.f32 %v1315_v26, %v1315_v26 }
 0x829   :  { %v1321_v28 = vsel %vm76_vm0, %v1317_v27, 0.0 }
 0x82a   :  { %1322 = vadd.xlane.f32.xlu0 %v1321_v28 }
 0x8af   :  { %v1320_v43 = vpop.xlane.xlu0 %1319 }
 0x8b0   :  { %v1324_v44 = vmul.f32 0.03125, %v1320_v43 }
 0x8b2   :  { %v1326_v42 = vadd.f32 1e-05, %v1324_v44 }
 0x8b3   :  { %v1323_v45 = vpop.xlane.xlu0 %1322 }
 0x8b4   :  { %1888 = vrsqrt.f32 %v1326_v42  ;;  %v1325_v46 = vmul.f32 0.03125, %v1323_v45  ;;  %v1561_v42 = vrot.slane %v2204_v7, %v1560_v40 }
 0x8b6   :  { %v1327_v47 = vadd.f32 1e-05, %v1325_v46 }
 0x8b8   :  { %1890 = vrsqrt.f32 %v1327_v47 }
 0x8c1   :  { %v1889_v48 = vpop.eup %1888 }
 0x8c2   :  { %v1330_v49 = vmul.f32 %v1889_v48, %v1314_v23 }
 0x8c4   :  { %v1336_v38 = vmul.f32 %v1335_v50, %v1330_v49 }
 0x8c5   :  { %v1891_v52 = vpop.eup %1890 }
 0x8c6   :  { %v1331_v53 = vmul.f32 %v1891_v52, %v1315_v26  ;;  %v1342_v39 = vadd.f32 %v1341_v54, %v1336_v38 }
 0x8c8   :  { %v1337_v55 = vmul.f32 %v1335_v50, %v1331_v53 }
 0x8ca   :  { %v1343_v56 = vadd.f32 %v1341_v54, %v1337_v55 }
 0x8cc   :  { %v1344_v57 = vpack.c.bf16 %v1343_v56, %v1342_v39 }
 0x8ce   :  { %1802 = vmatmul.mubr.msk.bf16.vlgmr.msra.gmra.mxu1 %vm76_vm0, %v1344_v57 }
 0x98e   :  { %v1405_v31 = vpop.f32.mrf.mxu1 }
 0x98f   :  { %v1406_v61 = vadd.f32 %v1613_v60, %v1405_v31 }
 0x990   :  { %v1803_v9 = vpop.f32.mrf.mxu1 }
 0x991   :  { %v1412_v29 = vmax.f32 %v1406_v61, 0.0 }
 0x992   :  { %v1408_v62 = vpop.f32.mrf.mxu1 }
 0x993   :  { %v1409_v63 = vadd.f32 %v1613_v60, %v1408_v62 }
 0x994   :  { %v1804_v2 = vpop.f32.mrf.mxu1 }
 0x995   :  { %v1413_v3 = vmax.f32 %v1409_v63, 0.0 }
 0x997   :  { %v1414_v4 = vpack.c.bf16 %v1413_v3, %v1412_v29 }
 0x999   :  { %1822 = vmatmul.mubr.bf16.vlgmr.msra.gmra.mxu0 %v1414_v4 }
 0xa59   :  { %v1517_v6 = vpop.f32.mrf.mxu0 }
 0xa5a   :  { %v1518_v8 = vadd.f32 %v1517_v6, %v1434_v5 }
 0xa5b   :  { %v1823_v11 = vpop.f32.mrf.mxu0 }
 0xa5c   :  { %v1524_v12 = vadd.f32 %v1518_v8, %v1342_v39 }
 0xa5d   :  { %v1520_v13 = vpop.f32.mrf.mxu0 }
 0xa5e   :  { %v1521_v14 = vadd.f32 %v1520_v13, %v1434_v5  ;;  %v1526_v15 = vsel %vm76_vm0, %v1524_v12, 0.0 }
 0xa5f   :  { %1527 = vadd.xlane.f32.xlu1 %v1526_v15  ;;  %v1824_v16 = vpop.f32.mrf.mxu0 }
 0xa60   :  { %v1525_v17 = vadd.f32 %v1521_v14, %v1343_v56 }
 0xa62   :  { %v1529_v18 = vsel %vm76_vm0, %v1525_v17, 0.0 }
 0xa63   :  { %1530 = vadd.xlane.f32.xlu0 %v1529_v18 }
 0xae8   :  { %v1528_v19 = vpop.xlane.xlu1 %1527 }
 0xae9   :  { %v1532_v20 = vmul.f32 0.03125, %v1528_v19 }
 0xaeb   :  { %v1534_v21 = vsub.f32 %v1524_v12, %v1532_v20 }
 0xaec   :  { %v1531_v22 = vpop.xlane.xlu0 %1530 }
 0xaed   :  { %v1533_v23 = vmul.f32 0.03125, %v1531_v22  ;;  %v1536_v37 = vmul.f32 %v1534_v21, %v1534_v21 }
 0xaef   :  { %v1535_v24 = vsub.f32 %v1525_v17, %v1533_v23  ;;  %v1538_v25 = vsel %vm76_vm0, %v1536_v37, 0.0 }
 0xaf0   :  { %1539 = vadd.xlane.f32.xlu1 %v1538_v25 }
 0xaf1   :  { %v1537_v26 = vmul.f32 %v1535_v24, %v1535_v24 }
 0xaf3   :  { %v1541_v0 = vsel %vm76_vm0, %v1537_v26, 0.0 }
 0xaf4   :  { %1542 = vadd.xlane.f32.xlu0 %v1541_v0 }
 0xb79   :  { %v1540_v27 = vpop.xlane.xlu1 %1539 }
 0xb7a   :  { %v1544_v28 = vmul.f32 0.03125, %v1540_v27 }
 0xb7c   :  { %v1546_v1 = vadd.f32 1e-05, %v1544_v28 }
 0xb7d   :  { %v1543_v30 = vpop.xlane.xlu0 %1542 }
 0xb7e   :  { %1892 = vrsqrt.f32 %v1546_v1  ;;  %v1545_v33 = vmul.f32 0.03125, %v1543_v30 }
 0xb80   :  { %v1547_v34 = vadd.f32 1e-05, %v1545_v33 }
 0xb82   :  { %1894 = vrsqrt.f32 %v1547_v34 }
 0xb8b   :  { %v1893_v43 = vpop.eup %1892 }
 0xb8c   :  { %v1550_v44 = vmul.f32 %v1893_v43, %v1534_v21 }
 0xb8e   :  { %v1556_v45 = vmul.f32 %v1555_v41, %v1550_v44 }
 0xb8f   :  { %v1895_v46 = vpop.eup %1894 }
 0xb90   :  { %v1551_v47 = vmul.f32 %v1895_v46, %v1535_v24  ;;  %v1562_v48 = vadd.f32 %v1561_v42, %v1556_v45 }
 0xb92   :  { %v1557_v49 = vmul.f32 %v1555_v41, %v1551_v47  ;;  %1564 = vst.msk [vmem:[#allocation3] sm:$0xff] %vm76_vm0, %v1562_v48 }
 0xb94   :  { %v1563_v50 = vadd.f32 %v1561_v42, %v1557_v49 }
 0xb96   :  { %1565 = vst.msk [vmem:[#allocation3 + $0x8] sm:$0xff] %vm76_vm0, %v1563_v50 }
 0xb97   :  { %1907 = shalt.err (!%p1904_p4)
}
 0xb98   :  { %s1925_s26 = smov 128  }
 0xb99   :  { %1577 = dma.vmem_to_hbm [thread:$0]  %s1572_s7, 256, %s2286_s8, [#allocation4], %s1925_s26, %s1925_s26, %s1921_s1  }
 0xb9a   :  { %1916 = dma.done.wait [#allocation4], 256  }
 0xb9b   :  { %1917 = vsyncadd [#allocation4], 4294967040 }
 0xb9c   :  { %1581 = vsyncpa [#allocation4], 1 }

</bundles_post_ra>
